<compile_context>
chip_gen: v7x
topology: tpu7x:2x2x1
jax: 0.10.0
libtpu: 0.0.40
codegen_flags: <defaults>
</compile_context>

<pallas_src>
import jax
import jax.numpy as jnp
from jax.experimental import pallas as pl
from jax.experimental.pallas import tpu as pltpu

Z_DIM = 2
HIDDEN = 64
HIDDEN_DIMS = (HIDDEN, HIDDEN)

LANES = 128
MAX_TB = 1024    # batch-tile cap: ~6 MiB live per tile, fits every generation


def _round_up(x, m):
    return ((x + m - 1) // m) * m


def _tiling(batch):
    """Pick (TB, padded_batch).  Lane-dense tiles (multiple of 128) and at
    least two grid steps when B > 128 so both v7x TensorCores get work; a
    single exact-size tile for tiny batches (block == full dim is legal)."""
    if batch <= LANES:
        return batch, batch
    tb = min(MAX_TB, _round_up(pl.cdiv(batch, 2), LANES))
    return tb, _round_up(batch, tb)


def _sigmoid_softplus(a):
    """Return (sigmoid(a), softplus(a)) sharing one exp (stable for all a)."""
    e = jnp.exp(-jnp.abs(a))
    r = 1.0 / (1.0 + e)
    sig = jnp.where(a >= 0.0, r, e * r)
    sp = jnp.maximum(a, 0.0) + jnp.log1p(e)
    return sig, sp


def _odefunc_kernel(t_ref, head_ref, zT_ref, sw_ref, w2z_ref, out_ref, x_scr):
    # t_ref   : (1,)  SMEM   time scalar
    # head_ref: (4,)  SMEM   [b3_0, b3_1, W3[0,0], W3[1,0]]
    # zT_ref  : (2, TB)      batch tile of states, feature-major
    # sw_ref  : (H, 8)       packed columns:
    #                        [W1[:,1], W1[:,2], b1, W1[:,0], b2, W2[:,0],
    #                         W3[0,1:], W3[1,1:]]
    # w2z_ref : (H, H)       W2[:,1:]
    # out_ref : (3, TB)      rows = [zdot0, zdot1, -divergence]
    # x_scr   : (H, 3*TB)    VMEM scratch for the stacked layer-2 operand
    TB = zT_ref.shape[1]
    t = t_ref[0]

    z0 = zT_ref[0:1, :]                               # (1, TB)
    z1 = zT_ref[1:2, :]

    w1c0 = sw_ref[:, 0:1]                             # (H, 1)
    w1c1 = sw_ref[:, 1:2]

    # ---- layer 1 (in = 2): VPU broadcast mul-adds, no MXU ------------------
    b1_eff = sw_ref[:, 2:3] + t * sw_ref[:, 3:4]      # b1 + t*W1[:,0]  (H,1)
    a1 = w1c0 * z0 + w1c1 * z1 + b1_eff               # (H, TB)
    s1, h1 = _sigmoid_softplus(a1)
    # stacked operand [h1 ; d h1/dz0 ; d h1/dz1] written straight to scratch
    x_scr[:, 0:TB] = h1
    x_scr[:, TB:2 * TB] = s1 * w1c0
    x_scr[:, 2 * TB:3 * TB] = s1 * w1c1

    # ---- layer 2 (H->H): one MXU matmul on the lane-stacked operand --------
    y = jnp.dot(w2z_ref[...], x_scr[...],
                preferred_element_type=jnp.float32,
                precision=jax.lax.Precision.HIGHEST)  # (H, 3*TB)
    b2_eff = sw_ref[:, 4:5] + t * sw_ref[:, 5:6]      # b2 + t*W2[:,0]
    a2 = y[:, 0:TB] + b2_eff
    u1 = y[:, TB:2 * TB]                              # d a2/dz0
    u2 = y[:, 2 * TB:3 * TB]                          # d a2/dz1
    s2, h2 = _sigmoid_softplus(a2)

    # ---- layer 3 (out = 2): VPU mul + cross-sublane sums, fused trace ------
    c0 = sw_ref[:, 6:7]                               # W3[0,1:] as column
    c1 = sw_ref[:, 7:8]                               # W3[1,1:] as column
    zd0 = jnp.sum(h2 * c0, axis=0, keepdims=True)     # (1, TB)
    zd1 = jnp.sum(h2 * c1, axis=0, keepdims=True)
    trace = jnp.sum(s2 * (u1 * c0 + u2 * c1), axis=0, keepdims=True)

    out_ref[0:1, :] = zd0 + (head_ref[0] + t * head_ref[2])
    out_ref[1:2, :] = zd1 + (head_ref[1] + t * head_ref[3])
    out_ref[2:3, :] = -trace


def preprocess_params(params):
    """One-time re-layout of PyTorch-style (W:(out,in+1), b:(out,)) params."""
    (W1, b1), (W2, b2), (W3, b3) = [
        (jnp.asarray(W, jnp.float32), jnp.asarray(b, jnp.float32))
        for W, b in params]
    smallw = jnp.stack([
        W1[:, 1], W1[:, 2],      # layer-1 z columns
        b1, W1[:, 0],            # layer-1 bias, time column
        b2, W2[:, 0],            # layer-2 bias, time column
        W3[0, 1:], W3[1, 1:],    # layer-3 z rows (as H-length columns)
    ], axis=1)                   # (H, 8)
    head = jnp.concatenate([b3, W3[:, 0]])   # (4,) = [b3_0, b3_1, w3t_0, w3t_1]
    return dict(smallw=smallw, head=head, w2z=W2[:, 1:])


def odefunc_forward(t, z, prepped):
    """Returns (z_dot, -divergence) — the ODEfunc.forward of the spec."""
    B = z.shape[0]
    t_arr = jnp.asarray(t, jnp.float32).reshape(1)
    zT = z.astype(jnp.float32).T                       # (2, B) feature-major

    TB, Bp = _tiling(B)
    if Bp != B:
        zT = jnp.pad(zT, ((0, 0), (0, Bp - B)))
    grid = (Bp // TB,)
    resident = lambda i: (0, 0)                        # weights stay in VMEM

    out = pl.pallas_call(
        _odefunc_kernel,
        grid=grid,
        in_specs=[
            pl.BlockSpec(memory_space=pltpu.MemorySpace.SMEM),   # t
            pl.BlockSpec(memory_space=pltpu.MemorySpace.SMEM),   # head scalars
            pl.BlockSpec((Z_DIM, TB), lambda i: (0, i)),         # z^T tile
            pl.BlockSpec((HIDDEN, 8), resident),                 # packed weights
            pl.BlockSpec((HIDDEN, HIDDEN), resident),            # W2 z-part
        ],
        out_specs=pl.BlockSpec((Z_DIM + 1, TB), lambda i: (0, i)),
        out_shape=jax.ShapeDtypeStruct((Z_DIM + 1, Bp), jnp.float32),
        scratch_shapes=[pltpu.VMEM((HIDDEN, 3 * TB), jnp.float32)],
        compiler_params=pltpu.CompilerParams(
            dimension_semantics=("parallel",),
            vmem_limit_bytes=32 << 20),
    )(t_arr, prepped["head"], zT, prepped["smallw"], prepped["w2z"])

    z_dot = out[0:Z_DIM, :B].T                        # (B, 2)
    neg_div = out[Z_DIM:Z_DIM + 1, :B].T              # (B, 1)
    return z_dot, neg_div


# ---------------- pure-JAX reference (mirrors the PyTorch module) -------------
def _get_z_dot_ref(t, z, params):
    h = z
    n = len(params)
    for i, (W, b) in enumerate(params):
        tz = jnp.concatenate(
            [jnp.full((z.shape[0], 1), t, dtype=z.dtype), h], axis=1)
        h = tz @ W.T + b
        if i < n - 1:
            h = jax.nn.softplus(h)
    return h


def _reference_forward(t, z, params):
    z_dot = _get_z_dot_ref(t, z, params)
    div = jnp.zeros((z.shape[0],), dtype=z.dtype)
    for i in range(z.shape[1]):
        e = jnp.zeros_like(z).at[:, i].set(1.0)
        _, tang = jax.jvp(lambda zz: _get_z_dot_ref(t, zz, params), (z,), (e,))
        div = div + tang[:, i]
    return z_dot, -div.reshape(z.shape[0], 1)


def _init_params(key):
    """Deterministic Linear params (PyTorch-style uniform init bounds)."""
    dim_list = [Z_DIM] + list(HIDDEN_DIMS) + [Z_DIM]
    params = []
    for i in range(len(dim_list) - 1):
        fan_in = dim_list[i] + 1
        fan_out = dim_list[i + 1]
        key, kw, kb = jax.random.split(key, 3)
        bound = 1.0 / jnp.sqrt(fan_in)
        W = jax.random.uniform(kw, (fan_out, fan_in), jnp.float32, -bound, bound)
        b = jax.random.uniform(kb, (fan_out,), jnp.float32, -bound, bound)
        params.append((W, b))
    return params


if __name__ == "__main__":
    key = jax.random.PRNGKey(0)
    key, kz_small, kz_big = jax.random.split(key, 3)

    params = _init_params(key)
    prepped = preprocess_params(params)          # hoisted: done once, not per step
    fwd = jax.jit(odefunc_forward)
    t = jnp.array(0.35, dtype=jnp.float32)

    # small single-tile batch AND a multi-tile batch not a multiple of the tile
    for B, kz in ((8, kz_small), (300, kz_big)):
        z = jax.random.normal(kz, (B, Z_DIM), dtype=jnp.float32)
        z_dot, neg_div = fwd(t, z, prepped)
        jax.block_until_ready((z_dot, neg_div))

        z_dot_ref, neg_div_ref = _reference_forward(t, z, params)
        assert z_dot.shape == (B, Z_DIM) and neg_div.shape == (B, 1)
        assert jnp.allclose(z_dot, z_dot_ref, atol=1e-5, rtol=1e-5), \
            f"z_dot mismatch at B={B}"
        assert jnp.allclose(neg_div, neg_div_ref, atol=1e-5, rtol=1e-5), \
            f"divergence mismatch at B={B}"

    print("KERNEL_OK")
</pallas_src>

<mosaic_0001>
module attributes {stable_mosaic.version = 11 : i64} {
  func.func @_odefunc_kernel(%arg0: i32, %arg1: memref<1xf32, #tpu.memory_space<smem>>, %arg2: memref<4xf32, #tpu.memory_space<smem>>, %arg3: memref<2x8xf32, #tpu.memory_space<vmem>>, %arg4: memref<64x8xf32, #tpu.memory_space<vmem>>, %arg5: memref<64x64xf32, #tpu.memory_space<vmem>>, %arg6: memref<3x8xf32, #tpu.memory_space<vmem>>, %arg7: memref<64x24xf32, #tpu.memory_space<vmem>>) attributes {dimension_semantics = [#tpu.dimension_semantics<parallel>], iteration_bounds = array<i64: 1>, scalar_prefetch = 0 : i64, scratch_operands = 1 : i64, tpu.core_type = #tpu.core_type<tc>, window_params = [{transform_indices = @transform_0, window_bounds = array<i64: 1>}, {transform_indices = @transform_1, window_bounds = array<i64: 4>}, {transform_indices = @transform_2, window_bounds = array<i64: 2, 8>}, {pipeline_mode = #tpu.pipeline_mode<synchronous>, transform_indices = @transform_3, window_bounds = array<i64: 64, 8>}, {pipeline_mode = #tpu.pipeline_mode<synchronous>, transform_indices = @transform_4, window_bounds = array<i64: 64, 64>}, {transform_indices = @transform_5, window_bounds = array<i64: 3, 8>}]} {
    %c0 = arith.constant 0 : index
    %0 = memref.load %arg1[%c0] : memref<1xf32, #tpu.memory_space<smem>>
    %c0_0 = arith.constant 0 : index
    %c0_1 = arith.constant 0 : index
    %1 = vector.load %arg3[%c0_0, %c0_1] : memref<2x8xf32, #tpu.memory_space<vmem>>, vector<1x8xf32>
    %c1 = arith.constant 1 : index
    %c0_2 = arith.constant 0 : index
    %2 = vector.load %arg3[%c1, %c0_2] : memref<2x8xf32, #tpu.memory_space<vmem>>, vector<1x8xf32>
    %c0_3 = arith.constant 0 : index
    %c0_4 = arith.constant 0 : index
    %3 = vector.load %arg4[%c0_3, %c0_4] : memref<64x8xf32, #tpu.memory_space<vmem>>, vector<64x1xf32>
    %c0_5 = arith.constant 0 : index
    %c1_6 = arith.constant 1 : index
    %4 = vector.load %arg4[%c0_5, %c1_6] : memref<64x8xf32, #tpu.memory_space<vmem>>, vector<64x1xf32>
    %c0_7 = arith.constant 0 : index
    %c2 = arith.constant 2 : index
    %5 = vector.load %arg4[%c0_7, %c2] : memref<64x8xf32, #tpu.memory_space<vmem>>, vector<64x1xf32>
    %c0_8 = arith.constant 0 : index
    %c3 = arith.constant 3 : index
    %6 = vector.load %arg4[%c0_8, %c3] : memref<64x8xf32, #tpu.memory_space<vmem>>, vector<64x1xf32>
    %7 = vector.broadcast %0 : f32 to vector<64x1xf32>
    %8 = arith.mulf %7, %6 : vector<64x1xf32>
    %9 = arith.addf %5, %8 : vector<64x1xf32>
    %10 = vector.broadcast %3 : vector<64x1xf32> to vector<64x8xf32>
    %11 = vector.broadcast %1 : vector<1x8xf32> to vector<64x8xf32>
    %12 = arith.mulf %10, %11 : vector<64x8xf32>
    %13 = vector.broadcast %4 : vector<64x1xf32> to vector<64x8xf32>
    %14 = vector.broadcast %2 : vector<1x8xf32> to vector<64x8xf32>
    %15 = arith.mulf %13, %14 : vector<64x8xf32>
    %16 = arith.addf %12, %15 : vector<64x8xf32>
    %17 = vector.broadcast %9 : vector<64x1xf32> to vector<64x8xf32>
    %18 = arith.addf %16, %17 : vector<64x8xf32>
    %19 = math.absf %18 : vector<64x8xf32>
    %cst = arith.constant 0.000000e+00 : f32
    %20 = vector.broadcast %cst : f32 to vector<64x8xf32>
    %21 = arith.subf %20, %19 : vector<64x8xf32>
    %22 = math.exp %21 : vector<64x8xf32>
    %cst_9 = arith.constant 1.000000e+00 : f32
    %23 = vector.broadcast %cst_9 : f32 to vector<64x8xf32>
    %24 = arith.addf %23, %22 : vector<64x8xf32>
    %cst_10 = arith.constant 1.000000e+00 : f32
    %25 = vector.broadcast %cst_10 : f32 to vector<64x8xf32>
    %26 = arith.divf %25, %24 : vector<64x8xf32>
    %cst_11 = arith.constant 0.000000e+00 : f32
    %27 = vector.broadcast %cst_11 : f32 to vector<64x8xf32>
    %28 = arith.cmpf oge, %18, %27 : vector<64x8xf32>
    %29 = arith.mulf %22, %26 : vector<64x8xf32>
    %30 = arith.select %28, %26, %29 : vector<64x8xi1>, vector<64x8xf32>
    %cst_12 = arith.constant 0.000000e+00 : f32
    %31 = vector.broadcast %cst_12 : f32 to vector<64x8xf32>
    %32 = arith.maximumf %18, %31 : vector<64x8xf32>
    %33 = math.log1p %22 : vector<64x8xf32>
    %34 = arith.addf %32, %33 : vector<64x8xf32>
    %c0_13 = arith.constant 0 : index
    %c0_14 = arith.constant 0 : index
    %35 = vector.load %arg7[%c0_13, %c0_14] : memref<64x24xf32, #tpu.memory_space<vmem>>, vector<64x8xf32>
    tpu.vector_store %arg7[%c0_13, %c0_14], %34 {strides = array<i32>} : memref<64x24xf32, #tpu.memory_space<vmem>>, vector<64x8xf32>,
    %36 = vector.broadcast %3 : vector<64x1xf32> to vector<64x8xf32>
    %37 = arith.mulf %30, %36 : vector<64x8xf32>
    %c0_15 = arith.constant 0 : index
    %c8 = arith.constant 8 : index
    %38 = vector.load %arg7[%c0_15, %c8] : memref<64x24xf32, #tpu.memory_space<vmem>>, vector<64x8xf32>
    tpu.vector_store %arg7[%c0_15, %c8], %37 {strides = array<i32>} : memref<64x24xf32, #tpu.memory_space<vmem>>, vector<64x8xf32>,
    %39 = vector.broadcast %4 : vector<64x1xf32> to vector<64x8xf32>
    %40 = arith.mulf %30, %39 : vector<64x8xf32>
    %c0_16 = arith.constant 0 : index
    %c16 = arith.constant 16 : index
    %41 = vector.load %arg7[%c0_16, %c16] : memref<64x24xf32, #tpu.memory_space<vmem>>, vector<64x8xf32>
    tpu.vector_store %arg7[%c0_16, %c16], %40 {strides = array<i32>} : memref<64x24xf32, #tpu.memory_space<vmem>>, vector<64x8xf32>,
    %c0_17 = arith.constant 0 : index
    %c0_18 = arith.constant 0 : index
    %42 = vector.load %arg5[%c0_17, %c0_18] : memref<64x64xf32, #tpu.memory_space<vmem>>, vector<64x64xf32>
    %c0_19 = arith.constant 0 : index
    %c0_20 = arith.constant 0 : index
    %43 = vector.load %arg7[%c0_19, %c0_20] : memref<64x24xf32, #tpu.memory_space<vmem>>, vector<64x24xf32>
    %cst_21 = arith.constant dense<0.000000e+00> : vector<64x24xf32>
    %44 = tpu.matmul %42, %43, %cst_21 {dimension_numbers = #tpu.dot_dimension_numbers<[1], [0], [0], [1], [0, 0, 1, 1], [], []>, precision = #tpu.contract_precision<fp32>} : vector<64x64xf32>, vector<64x24xf32>, vector<64x24xf32> -> vector<64x24xf32>
    %c0_22 = arith.constant 0 : index
    %c4 = arith.constant 4 : index
    %45 = vector.load %arg4[%c0_22, %c4] : memref<64x8xf32, #tpu.memory_space<vmem>>, vector<64x1xf32>
    %c0_23 = arith.constant 0 : index
    %c5 = arith.constant 5 : index
    %46 = vector.load %arg4[%c0_23, %c5] : memref<64x8xf32, #tpu.memory_space<vmem>>, vector<64x1xf32>
    %47 = vector.broadcast %0 : f32 to vector<64x1xf32>
    %48 = arith.mulf %47, %46 : vector<64x1xf32>
    %49 = arith.addf %45, %48 : vector<64x1xf32>
    %50 = vector.extract_strided_slice %44 {offsets = [0, 0], sizes = [64, 8], strides = [1, 1]} : vector<64x24xf32> to vector<64x8xf32>
    %51 = vector.broadcast %49 : vector<64x1xf32> to vector<64x8xf32>
    %52 = arith.addf %50, %51 : vector<64x8xf32>
    %53 = vector.extract_strided_slice %44 {offsets = [0, 8], sizes = [64, 8], strides = [1, 1]} : vector<64x24xf32> to vector<64x8xf32>
    %54 = vector.extract_strided_slice %44 {offsets = [0, 16], sizes = [64, 8], strides = [1, 1]} : vector<64x24xf32> to vector<64x8xf32>
    %55 = math.absf %52 : vector<64x8xf32>
    %cst_24 = arith.constant 0.000000e+00 : f32
    %56 = vector.broadcast %cst_24 : f32 to vector<64x8xf32>
    %57 = arith.subf %56, %55 : vector<64x8xf32>
    %58 = math.exp %57 : vector<64x8xf32>
    %cst_25 = arith.constant 1.000000e+00 : f32
    %59 = vector.broadcast %cst_25 : f32 to vector<64x8xf32>
    %60 = arith.addf %59, %58 : vector<64x8xf32>
    %cst_26 = arith.constant 1.000000e+00 : f32
    %61 = vector.broadcast %cst_26 : f32 to vector<64x8xf32>
    %62 = arith.divf %61, %60 : vector<64x8xf32>
    %cst_27 = arith.constant 0.000000e+00 : f32
    %63 = vector.broadcast %cst_27 : f32 to vector<64x8xf32>
    %64 = arith.cmpf oge, %52, %63 : vector<64x8xf32>
    %65 = arith.mulf %58, %62 : vector<64x8xf32>
    %66 = arith.select %64, %62, %65 : vector<64x8xi1>, vector<64x8xf32>
    %cst_28 = arith.constant 0.000000e+00 : f32
    %67 = vector.broadcast %cst_28 : f32 to vector<64x8xf32>
    %68 = arith.maximumf %52, %67 : vector<64x8xf32>
    %69 = math.log1p %58 : vector<64x8xf32>
    %70 = arith.addf %68, %69 : vector<64x8xf32>
    %c0_29 = arith.constant 0 : index
    %c6 = arith.constant 6 : index
    %71 = vector.load %arg4[%c0_29, %c6] : memref<64x8xf32, #tpu.memory_space<vmem>>, vector<64x1xf32>
    %c0_30 = arith.constant 0 : index
    %c7 = arith.constant 7 : index
    %72 = vector.load %arg4[%c0_30, %c7] : memref<64x8xf32, #tpu.memory_space<vmem>>, vector<64x1xf32>
    %73 = vector.broadcast %71 : vector<64x1xf32> to vector<64x8xf32>
    %74 = arith.mulf %70, %73 : vector<64x8xf32>
    %cst_31 = arith.constant dense<0.000000e+00> : vector<8xf32>
    %75 = vector.multi_reduction <add>, %74, %cst_31 [0] : vector<64x8xf32> to vector<8xf32>
    %76 = vector.shape_cast %75 : vector<8xf32> to vector<1x8xf32>
    %77 = vector.broadcast %72 : vector<64x1xf32> to vector<64x8xf32>
    %78 = arith.mulf %70, %77 : vector<64x8xf32>
    %cst_32 = arith.constant dense<0.000000e+00> : vector<8xf32>
    %79 = vector.multi_reduction <add>, %78, %cst_32 [0] : vector<64x8xf32> to vector<8xf32>
    %80 = vector.shape_cast %79 : vector<8xf32> to vector<1x8xf32>
    %81 = vector.broadcast %71 : vector<64x1xf32> to vector<64x8xf32>
    %82 = arith.mulf %53, %81 : vector<64x8xf32>
    %83 = vector.broadcast %72 : vector<64x1xf32> to vector<64x8xf32>
    %84 = arith.mulf %54, %83 : vector<64x8xf32>
    %85 = arith.addf %82, %84 : vector<64x8xf32>
    %86 = arith.mulf %66, %85 : vector<64x8xf32>
    %cst_33 = arith.constant dense<0.000000e+00> : vector<8xf32>
    %87 = vector.multi_reduction <add>, %86, %cst_33 [0] : vector<64x8xf32> to vector<8xf32>
    %88 = vector.shape_cast %87 : vector<8xf32> to vector<1x8xf32>
    %c0_34 = arith.constant 0 : index
    %89 = memref.load %arg2[%c0_34] : memref<4xf32, #tpu.memory_space<smem>>
    %c2_35 = arith.constant 2 : index
    %90 = memref.load %arg2[%c2_35] : memref<4xf32, #tpu.memory_space<smem>>
    %91 = arith.mulf %0, %90 : f32
    %92 = arith.addf %89, %91 : f32
    %93 = vector.broadcast %92 : f32 to vector<1x8xf32>
    %94 = arith.addf %76, %93 : vector<1x8xf32>
    %c0_36 = arith.constant 0 : index
    %c0_37 = arith.constant 0 : index
    %95 = vector.load %arg6[%c0_36, %c0_37] : memref<3x8xf32, #tpu.memory_space<vmem>>, vector<1x8xf32>
    tpu.vector_store %arg6[%c0_36, %c0_37], %94 {strides = array<i32>} : memref<3x8xf32, #tpu.memory_space<vmem>>, vector<1x8xf32>,
    %c1_38 = arith.constant 1 : index
    %96 = memref.load %arg2[%c1_38] : memref<4xf32, #tpu.memory_space<smem>>
    %c3_39 = arith.constant 3 : index
    %97 = memref.load %arg2[%c3_39] : memref<4xf32, #tpu.memory_space<smem>>
    %98 = arith.mulf %0, %97 : f32
    %99 = arith.addf %96, %98 : f32
    %100 = vector.broadcast %99 : f32 to vector<1x8xf32>
    %101 = arith.addf %80, %100 : vector<1x8xf32>
    %c1_40 = arith.constant 1 : index
    %c0_41 = arith.constant 0 : index
    %102 = vector.load %arg6[%c1_40, %c0_41] : memref<3x8xf32, #tpu.memory_space<vmem>>, vector<1x8xf32>
    tpu.vector_store %arg6[%c1_40, %c0_41], %101 {strides = array<i32>} : memref<3x8xf32, #tpu.memory_space<vmem>>, vector<1x8xf32>,
    %cst_42 = arith.constant 0.000000e+00 : f32
    %103 = vector.broadcast %cst_42 : f32 to vector<1x8xf32>
    %104 = arith.subf %103, %88 : vector<1x8xf32>
    %c2_43 = arith.constant 2 : index
    %c0_44 = arith.constant 0 : index
    %105 = vector.load %arg6[%c2_43, %c0_44] : memref<3x8xf32, #tpu.memory_space<vmem>>, vector<1x8xf32>
    tpu.vector_store %arg6[%c2_43, %c0_44], %104 {strides = array<i32>} : memref<3x8xf32, #tpu.memory_space<vmem>>, vector<1x8xf32>,
    return
  }
  func.func @transform_0(%arg0: i32) -> i32 {
    %c0_i32 = arith.constant 0 : i32
    %c0_i32_0 = arith.constant 0 : i32
    return %c0_i32 : i32
  }
  func.func @transform_1(%arg0: i32) -> i32 {
    %c0_i32 = arith.constant 0 : i32
    %c0_i32_0 = arith.constant 0 : i32
    return %c0_i32 : i32
  }
  func.func @transform_2(%arg0: i32) -> (i32, i32) {
    %c0_i32 = arith.constant 0 : i32
    %c0_i32_0 = arith.constant 0 : i32
    return %c0_i32, %arg0 : i32, i32
  }
  func.func @transform_3(%arg0: i32) -> (i32, i32) {
    %c0_i32 = arith.constant 0 : i32
    %c0_i32_0 = arith.constant 0 : i32
    %c0_i32_1 = arith.constant 0 : i32
    return %c0_i32, %c0_i32_0 : i32, i32
  }
  func.func @transform_4(%arg0: i32) -> (i32, i32) {
    %c0_i32 = arith.constant 0 : i32
    %c0_i32_0 = arith.constant 0 : i32
    %c0_i32_1 = arith.constant 0 : i32
    return %c0_i32, %c0_i32_0 : i32, i32
  }
  func.func @transform_5(%arg0: i32) -> (i32, i32) {
    %c0_i32 = arith.constant 0 : i32
    %c0_i32_0 = arith.constant 0 : i32
    return %c0_i32, %arg0 : i32, i32
  }
}

</mosaic_0001>

<bundles_post_ra>
// kernel: odefunc_forward.1
= control target key start
LH: loop header
LB: loop body
LE: loop exit
PB: predicated region body
PF: predicated region fallthrough
CT: control target
= control target key end

     0   :  { %11 = vsyncpa [#allocation5], 0  ;;  %s3483_s0 = inlined_call_operand.<no memory space> [shape: f32[1], index: 0, kind: input, shape index: {}]   ;;  %s3484_s1 = inlined_call_operand.vmem [shape: f32[4], index: 1, kind: input, shape index: {}]   ;;  %s3485_s2 = inlined_call_operand.vmem [shape: f32[2,8], index: 2, kind: input, shape index: {}]   ;;  %s3486_s3 = inlined_call_operand.vmem [shape: f32[64,8], index: 3, kind: input, shape index: {}]   ;;  %s3487_s4 = inlined_call_operand.vmem [shape: f32[64,64], index: 4, kind: input, shape index: {}]   ;;  %s3488_s5 = inlined_call_operand.vmem [shape: f32[3,8], index: 5, kind: output, shape index: {}]  }
   0x1   :  { %s20_s20 = sshll.u32 %s3484_s1, 4  ;;  %s21_s20 = int_to_ptr.vmem [resolvable:$true] %s20_s20 }
   0x2   :  { %s2472_s21 = scalar_lea.vmem %s21_s20, 16  ;;  %p2477_p1 = scmp.lt.s32.totalorder %s21_s20, %s21_s20 }
   0x3   :  { %p2473_p0 = scmp.ne.s32.totalorder %s21_s20, %s2472_s21  ;;  %p2478_p2 = scmp.lt.s32.totalorder %s2472_s21, %s2472_s21 }
   0x5   :  { %p2479_p3 = por %p2478_p2, %p2477_p1 }
   0x7   :  { %p2480_p4 = pnand %p2479_p3, %p2473_p0 }
   0x9   :  { %2483 = shalt.err (!%p2480_p4)
}
   0xa   :  { %s2486_s22 = smov [#allocation4]  }
   0xb   :  { %23 = dma.vmem_to_smem %s21_s20, 16, %s2486_s22, [#allocation5]  }
   0xc   :  { %2484 = dma.done.wait [#allocation5], 16  }
   0xd   :  { %2485 = vsyncadd [#allocation5], 4294967280 }
   0xe   :  { %33 = sfence }
   0xf   :  { %v39_v0 = vld [vmem:[%s3486_s3 + $0x10] sm:$0xff]  ;;  %v2536_v1 = vstv %s3483_s0  ;;  %v37_v2 = vld [vmem:[%s3486_s3] sm:$0xff]  ;;  %v40_v3 = vld [vmem:[%s3486_s3 + $0x18] sm:$0xff]  ;;  %v2487_v7 = vmov 0   ;;  %v2488_v8 = vmov 1   ;;  %s2489_s7 = smov 127  }
  0x10   :  { %v48_v4 = vmul.f32 %v2536_v1, %v39_v0  ;;  %v46_v5 = vmul.f32 %v2536_v1, %v37_v2  ;;  %v38_v6 = vld [vmem:[%s3486_s3 + $0x8] sm:$0xff]  ;;  %2357 = vset.pattern.permute.xlu1 %v2487_v7  ;;  %2359 = vset.pattern.permute.xlu0 %v2488_v8  ;;  %v49_v9 = vmul.f32 %v2536_v1, %v40_v3  ;;  %v41_v12 = vld [vmem:[%s3486_s3 + $0x20] sm:$0xff]  ;;  %v44_v15 = vld [vmem:[%s3486_s3 + $0x38] sm:$0xff]  ;;  %v2490_v19 = vmov 2   ;;  %s2492_s20 = smov 16   ;;  %s3416_s25 = sld [smem:[#allocation4 + $0x2]] }
  0x11   :  { %v47_v10 = vmul.f32 %v2536_v1, %v38_v6  ;;  %v42_v11 = vld [vmem:[%s3486_s3 + $0x28] sm:$0xff]  ;;  %v50_v14 = vmul.f32 %v2536_v1, %v41_v12  ;;  %v43_v16 = vld [vmem:[%s3486_s3 + $0x30] sm:$0xff]  ;;  %v53_v17 = vmul.f32 %v2536_v1, %v44_v15  ;;  %v1941_v49 = vld [vmem:[%s3485_s2] ss:$0 sm:$0xff]  ;;  %vm414_vm1 = vcmask 64512   ;;  %s3428_s26 = sld [smem:[#allocation4 + $0x3]] }
  0x12   :  { %66 = vrot.lane.b32.xlu1 %v48_v4, %s2489_s7  ;;  %62 = vrot.lane.b32.xlu0 %v46_v5, %s2489_s7  ;;  %v51_v13 = vmul.f32 %v2536_v1, %v42_v11  ;;  %v52_v18 = vmul.f32 %v2536_v1, %v43_v16  ;;  %v1942_v50 = vld [vmem:[%s3485_s2 + $0x1] ss:$0 sm:$0xff]  ;;  %s2491_s2 = smov 8   ;;  %s1919_s1 = sld [smem:[#allocation4]] }
  0x13   :  { %s1944_s27 = sld [smem:[#allocation4 + $0x1]] }
  0x16   :  { %68 = vrot.lane.b32.xlu1 %v49_v9, %s2489_s7  ;;  %64 = vrot.lane.b32.xlu0 %v47_v10, %s2489_s7  ;;  %s1921_s30 = smul.f32 %s3416_s25, %s3483_s0 }
  0x17   :  { %s1929_s9 = smul.f32 %s3428_s26, %s3483_s0 }
  0x18   :  { %s1922_s10 = sadd.f32 %s1921_s30, %s1919_s1 }
  0x19   :  { %s1930_s11 = sadd.f32 %s1944_s27, %s1929_s9 }
  0x1a   :  { %72 = vrot.lane.b32.xlu1 %v51_v13, %s2489_s7  ;;  %70 = vrot.lane.b32.xlu0 %v50_v14, %s2489_s7 }
  0x1e   :  { %76 = vrot.lane.b32.xlu1 %v53_v17, %s2489_s7  ;;  %74 = vrot.lane.b32.xlu0 %v52_v18, %s2489_s7 }
  0x22   :  { %101 = vperm.xlu1 %2357, %v38_v6   ;;  %151 = vperm.xlu0 %2359, %v38_v6  }
  0x26   :  { %2358 = vset.pattern.permute.xlu1 %v2488_v8  ;;  %155 = vperm.xlu0 %2359, %v39_v0  }
  0x27   :  { %147 = vperm.xlu1 %2358, %v37_v2  }
  0x2a   :  { %2361 = vset.pattern.permute.xlu0 %v2487_v7 }
  0x2b   :  { %2360 = vset.pattern.permute.xlu1 %v2487_v7  ;;  %96 = vperm.xlu0 %2361, %v37_v2  }
  0x2c   :  { %106 = vperm.xlu1 %2360, %v39_v0  }
  0x2f   :  { %121 = vperm.xlu0 %2361, %v42_v11  }
  0x30   :  { %111 = vperm.xlu1 %2360, %v40_v3  }
  0x33   :  { %131 = vperm.xlu0 %2361, %v44_v15  }
  0x34   :  { %2362 = vset.pattern.permute.xlu1 %v2488_v8 }
  0x35   :  { %159 = vperm.xlu1 %2362, %v40_v3  }
  0x37   :  { %2367 = vset.pattern.permute.xlu0 %v2490_v19 }
  0x39   :  { %2363 = vset.pattern.permute.xlu1 %v2487_v7 }
  0x3a   :  { %116 = vperm.xlu1 %2363, %v41_v12  }
  0x3e   :  { %2364 = vset.pattern.permute.xlu1 %v2488_v8 }
  0x3f   :  { %163 = vperm.xlu1 %2364, %v41_v12  }
  0x43   :  { %167 = vperm.xlu1 %2364, %v42_v11  }
  0x47   :  { %2365 = vset.pattern.permute.xlu1 %v2487_v7 }
  0x48   :  { %126 = vperm.xlu1 %2365, %v43_v16  }
  0x4c   :  { %2366 = vset.pattern.permute.xlu1 %v2488_v8 }
  0x4d   :  { %171 = vperm.xlu1 %2366, %v43_v16  }
  0x51   :  { %175 = vperm.xlu1 %2366, %v44_v15  }
  0x55   :  { %2368 = vset.pattern.permute.xlu1 %v2490_v19 }
  0x84   :  { %v67_v20 = vpop.permute.xlu1 %66  ;;  %v63_v21 = vpop.permute.xlu0 %62 }
  0x85   :  { %v86_v22 = vadd.f32 %v63_v21, %v37_v2  ;;  %v88_v23 = vadd.f32 %v67_v20, %v39_v0 }
  0x87   :  { %200 = vperm.xlu0 %2367, %v86_v22  }
  0x88   :  { %v69_v24 = vpop.permute.xlu1 %68  ;;  %v65_v25 = vpop.permute.xlu0 %64 }
  0x89   :  { %v87_v26 = vadd.f32 %v65_v25, %v38_v6  ;;  %v89_v27 = vadd.f32 %v69_v24, %v40_v3 }
  0x8b   :  { %210 = vperm.xlu0 %2367, %v88_v23   ;;  %205 = vperm.xlu1 %2368, %v87_v26  }
  0x8c   :  { %v73_v28 = vpop.permute.xlu1 %72  ;;  %v71_v29 = vpop.permute.xlu0 %70 }
  0x8d   :  { %v90_v30 = vadd.f32 %v71_v29, %v41_v12  ;;  %v91_v31 = vadd.f32 %v73_v28, %v42_v11 }
  0x8f   :  { %215 = vperm.xlu1 %2368, %v89_v27   ;;  %220 = vperm.xlu0 %2367, %v90_v30  }
  0x90   :  { %v77_v32 = vpop.permute.xlu1 %76  ;;  %v75_v33 = vpop.permute.xlu0 %74 }
  0x91   :  { %v93_v34 = vadd.f32 %v77_v32, %v44_v15  ;;  %v92_v35 = vadd.f32 %v75_v33, %v43_v16 }
  0x93   :  { %225 = vperm.xlu1 %2368, %v91_v31   ;;  %235 = vperm.xlu0 %2367, %v93_v34  }
  0x97   :  { %230 = vperm.xlu1 %2368, %v92_v35  }
  0xa1   :  { %v2575_v36 = vpop.permute.xlu1 %101  ;;  %v2587_v42 = vpop.permute.xlu0 %151 }
  0xa2   :  { %v139_v55 = vmul.f32 %v1941_v49, %v2575_v36  ;;  %v183_v56 = vmul.f32 %v1942_v50, %v2587_v42 }
  0xa4   :  { %v191_v2 = vadd.f32 %v183_v56, %v139_v55 }
  0xa5   :  { %v2591_v44 = vpop.permute.xlu0 %155 }
  0xa6   :  { %v2577_v37 = vpop.permute.xlu1 %147  ;;  %v184_v57 = vmul.f32 %v1942_v50, %v2591_v44 }
  0xa7   :  { %v182_v52 = vmul.f32 %v1942_v50, %v2577_v37 }
  0xaa   :  { %v2595_v46 = vpop.permute.xlu0 %96 }
  0xab   :  { %v2579_v38 = vpop.permute.xlu1 %106  ;;  %v138_v53 = vmul.f32 %v1941_v49, %v2595_v46 }
  0xac   :  { %v140_v58 = vmul.f32 %v1941_v49, %v2579_v38 }
  0xad   :  { %v190_v59 = vadd.f32 %v182_v52, %v138_v53 }
  0xae   :  { %v2599_v48 = vpop.permute.xlu0 %121  ;;  %v192_v6 = vadd.f32 %v184_v57, %v140_v58 }
  0xaf   :  { %v2581_v39 = vpop.permute.xlu1 %111  ;;  %v143_v13 = vmul.f32 %v1941_v49, %v2599_v48 }
  0xb0   :  { %v141_v63 = vmul.f32 %v1941_v49, %v2581_v39 }
  0xb2   :  { %v2611_v54 = vpop.permute.xlu0 %131 }
  0xb3   :  { %v145_v14 = vmul.f32 %v1941_v49, %v2611_v54 }
  0xb4   :  { %v2583_v40 = vpop.permute.xlu1 %159 }
  0xb5   :  { %v185_v0 = vmul.f32 %v1942_v50, %v2583_v40 }
  0xb7   :  { %v193_v15 = vadd.f32 %v185_v0, %v141_v63 }
  0xb9   :  { %v2585_v41 = vpop.permute.xlu1 %116 }
  0xba   :  { %v142_v3 = vmul.f32 %v1941_v49, %v2585_v41 }
  0xbe   :  { %v2589_v43 = vpop.permute.xlu1 %163 }
  0xbf   :  { %v186_v4 = vmul.f32 %v1942_v50, %v2589_v43 }
  0xc1   :  { %v194_v19 = vadd.f32 %v186_v4, %v142_v3 }
  0xc2   :  { %v2593_v45 = vpop.permute.xlu1 %167 }
  0xc3   :  { %v187_v12 = vmul.f32 %v1942_v50, %v2593_v45 }
  0xc5   :  { %v195_v28 = vadd.f32 %v187_v12, %v143_v13 }
  0xc7   :  { %v2597_v47 = vpop.permute.xlu1 %126 }
  0xc8   :  { %v144_v26 = vmul.f32 %v1941_v49, %v2597_v47 }
  0xcc   :  { %v2607_v51 = vpop.permute.xlu1 %171 }
  0xcd   :  { %v188_v29 = vmul.f32 %v1942_v50, %v2607_v51 }
  0xcf   :  { %v196_v58 = vadd.f32 %v188_v29, %v144_v26 }
  0xd0   :  { %v2617_v60 = vpop.permute.xlu1 %175 }
  0xd1   :  { %v189_v16 = vmul.f32 %v1942_v50, %v2617_v60 }
  0xd3   :  { %v197_v32 = vadd.f32 %v189_v16, %v145_v14 }
 0x106   :  { %v201_v61 = vpop.permute.xlu0 %200 }
 0x107   :  { %v2619_v62 = vadd.f32 %v201_v61, %v190_v59 }
 0x109   :  { %v246_v5 = vand.u32 2147483647, %v2619_v62  ;;  %vm302_vm0 = vcmp.ge.f32.partialorder %v2619_v62, 0.0 }
 0x10a   :  { %v206_v7 = vpop.permute.xlu1 %205  ;;  %v211_v8 = vpop.permute.xlu0 %210 }
 0x10b   :  { %v254_v9 = vsub.f32 0.0, %v246_v5  ;;  %v2626_v10 = vadd.f32 %v206_v7, %v191_v2  ;;  %v2628_v11 = vadd.f32 %v211_v8, %v192_v6 }
 0x10d   :  { %v262_v17 = vmul.f32 1.442695, %v254_v9  ;;  %v247_v18 = vand.u32 2147483647, %v2626_v10  ;;  %v248_v20 = vand.u32 2147483647, %v2628_v11 }
 0x10e   :  { %v216_v21 = vpop.permute.xlu1 %215  ;;  %v221_v22 = vpop.permute.xlu0 %220  ;;  %vm303_vm2 = vcmp.ge.f32.partialorder %v2626_v10, 0.0  ;;  %vm304_vm4 = vcmp.ge.f32.partialorder %v2628_v11, 0.0 }
 0x10f   :  { %2376 = vpow2.f32 %v262_v17  ;;  %v255_v23 = vsub.f32 0.0, %v247_v18  ;;  %v2636_v24 = vadd.f32 %v216_v21, %v193_v15  ;;  %v2638_v25 = vadd.f32 %v221_v22, %v194_v19 }
 0x110   :  { %v256_v27 = vsub.f32 0.0, %v248_v20  ;;  %v326_v20 = vmax.f32 %v2619_v62, 0.0 }
 0x111   :  { %v264_v30 = vmul.f32 1.442695, %v255_v23  ;;  %v249_v31 = vand.u32 2147483647, %v2636_v24  ;;  %v250_v34 = vand.u32 2147483647, %v2638_v25 }
 0x112   :  { %v266_v33 = vmul.f32 1.442695, %v256_v27  ;;  %v226_v35 = vpop.permute.xlu1 %225  ;;  %v236_v52 = vpop.permute.xlu0 %235  ;;  %v327_v23 = vmax.f32 %v2626_v10, 0.0  ;;  %vm305_vm7 = vcmp.ge.f32.partialorder %v2636_v24, 0.0  ;;  %vm306_vm10 = vcmp.ge.f32.partialorder %v2638_v25, 0.0 }
 0x113   :  { %2378 = vpow2.f32 %v264_v30  ;;  %v257_v53 = vsub.f32 0.0, %v249_v31  ;;  %v2644_v55 = vadd.f32 %v226_v35, %v195_v28  ;;  %v2646_v56 = vadd.f32 %v236_v52, %v197_v32 }
 0x114   :  { %2380 = vpow2.f32 %v266_v33  ;;  %v258_v49 = vsub.f32 0.0, %v250_v34  ;;  %v328_v31 = vmax.f32 %v2628_v11, 0.0  ;;  %v329_v35 = vmax.f32 %v2636_v24, 0.0 }
 0x115   :  { %v268_v57 = vmul.f32 1.442695, %v257_v53  ;;  %v251_v50 = vand.u32 2147483647, %v2644_v55  ;;  %v253_v61 = vand.u32 2147483647, %v2646_v56 }
 0x116   :  { %v270_v59 = vmul.f32 1.442695, %v258_v49  ;;  %v231_v63 = vpop.permute.xlu1 %230  ;;  %v330_v52 = vmax.f32 %v2638_v25, 0.0  ;;  %vm307_vm13 = vcmp.ge.f32.partialorder %v2644_v55, 0.0  ;;  %vm309_vm15 = vcmp.ge.f32.partialorder %v2646_v56, 0.0 }
 0x117   :  { %2382 = vpow2.f32 %v268_v57  ;;  %v259_v0 = vsub.f32 0.0, %v251_v50  ;;  %v2650_v2 = vadd.f32 %v231_v63, %v196_v58  ;;  %v261_v3 = vsub.f32 0.0, %v253_v61 }
 0x118   :  { %2384 = vpow2.f32 %v270_v59 }
 0x119   :  { %v2377_v4 = vpop.eup %2376  ;;  %v272_v5 = vmul.f32 1.442695, %v259_v0  ;;  %v252_v6 = vand.u32 2147483647, %v2650_v2  ;;  %v276_v7 = vmul.f32 1.442695, %v261_v3 }
 0x11a   :  { %v278_v8 = vadd.f32 1.0, %v2377_v4  ;;  %v337_v17 = vmul.f32 -0.5, %v2377_v4  ;;  %v340_v27 = vand.u32 2147483647, %v2377_v4  ;;  %vm308_vm14 = vcmp.ge.f32.partialorder %v2650_v2, 0.0 }
 0x11b   :  { %2386 = vpow2.f32 %v272_v5  ;;  %v260_v9 = vsub.f32 0.0, %v252_v6 }
 0x11c   :  { %2388 = vpow2.f32 %v276_v7  ;;  %v338_v29 = vadd.f32 1.0, %v337_v17  ;;  %vm2681_vm3 = vcmp.lt.f32.partialorder %v340_v27, 0.0004427343 }
 0x11d   :  { %v2653_v12 = vpop.eup %2378  ;;  %v274_v13 = vmul.f32 1.442695, %v260_v9  ;;  %2390 = vrcp.f32 %v278_v8 }
 0x11e   :  { %v2655_v14 = vpop.eup %2380  ;;  %v279_v15 = vadd.f32 1.0, %v2653_v12  ;;  %2392 = vlog2.f32 %v278_v8  ;;  %v346_v18 = vmul.f32 -0.5, %v2653_v12  ;;  %v349_v30 = vand.u32 2147483647, %v2653_v12 }
 0x11f   :  { %2394 = vpow2.f32 %v274_v13  ;;  %v280_v16 = vadd.f32 1.0, %v2655_v14  ;;  %v355_v21 = vmul.f32 -0.5, %v2655_v14  ;;  %v358_v33 = vand.u32 2147483647, %v2655_v14 }
 0x120   :  { %2396 = vrcp.f32 %v279_v15  ;;  %v347_v32 = vadd.f32 1.0, %v346_v18  ;;  %v339_v61 = vmul.f32 %v2377_v4, %v338_v29  ;;  %vm2687_vm5 = vcmp.lt.f32.partialorder %v349_v30, 0.0004427343 }
 0x121   :  { %v2660_v19 = vpop.eup %2382  ;;  %2398 = vrcp.f32 %v280_v16  ;;  %v356_v53 = vadd.f32 1.0, %v355_v21  ;;  %vm2693_vm6 = vcmp.lt.f32.partialorder %v358_v33, 0.0004427343 }
 0x122   :  { %v2665_v22 = vpop.eup %2384  ;;  %v281_v26 = vadd.f32 1.0, %v2660_v19  ;;  %2400 = vlog2.f32 %v279_v15  ;;  %v364_v58 = vmul.f32 -0.5, %v2660_v19  ;;  %v367_v0 = vand.u32 2147483647, %v2660_v19 }
 0x123   :  { %v282_v28 = vadd.f32 1.0, %v2665_v22  ;;  %2402 = vlog2.f32 %v280_v16  ;;  %v348_v6 = vmul.f32 %v2653_v12, %v347_v32  ;;  %v373_v8 = vmul.f32 -0.5, %v2665_v22 }
 0x124   :  { %2404 = vrcp.f32 %v281_v26  ;;  %v357_v15 = vmul.f32 %v2655_v14, %v356_v53  ;;  %v376_v16 = vand.u32 2147483647, %v2665_v22  ;;  %v365_v21 = vadd.f32 1.0, %v364_v58 }
 0x125   :  { %v2674_v34 = vpop.eup %2386  ;;  %2406 = vrcp.f32 %v282_v28  ;;  %vm2710_vm8 = vcmp.lt.f32.partialorder %v367_v0, 0.0004427343 }
 0x126   :  { %v2678_v49 = vpop.eup %2388  ;;  %v283_v57 = vadd.f32 1.0, %v2674_v34  ;;  %2408 = vlog2.f32 %v281_v26  ;;  %v382_v50 = vmul.f32 -0.5, %v2674_v34  ;;  %vm2725_vm9 = vcmp.lt.f32.partialorder %v376_v16, 0.0004427343 }
 0x127   :  { %v2391_v59 = vpop.eup %2390  ;;  %2410 = vlog2.f32 %v282_v28  ;;  %v2716_v33 = vadd.f32 1.0, %v2678_v49  ;;  %v385_v7 = vand.u32 2147483647, %v2674_v34 }
 0x128   :  { %v2393_v3 = vpop.eup %2392  ;;  %v310_v5 = vmul.f32 %v2391_v59, %v2377_v4  ;;  %2412 = vrcp.f32 %v283_v57 }
 0x129   :  { %v2698_v9 = vpop.eup %2394  ;;  %v336_v13 = vmul.f32 0.6931472, %v2393_v3  ;;  %2414 = vlog2.f32 %v283_v57  ;;  %v374_v57 = vadd.f32 1.0, %v373_v8  ;;  %vm386_vm11 = vcmp.lt.f32.partialorder %v385_v7, 0.0004427343  ;;  %v2841_v7 = vld [vmem:[%s3486_s3 + $0x20] sm:$0xff] }
 0x12a   :  { %v2397_v17 = vpop.eup %2396  ;;  %v318_v4 = vsel %vm302_vm0, %v2391_v59, %v310_v5  ;;  %v284_v18 = vadd.f32 1.0, %v2698_v9  ;;  %v394_v30 = vand.u32 2147483647, %v2698_v9 }
 0x12b   :  { %v2399_v26 = vpop.eup %2398  ;;  %v423_v27 = vmul.f32 %v318_v4, %v2595_v46  ;;  %v311_v28 = vmul.f32 %v2397_v17, %v2653_v12  ;;  %v342_v29 = vsel %vm2681_vm3, %v339_v61, %v336_v13  ;;  %v472_v5 = vmul.f32 %v318_v4, %v2577_v37 }
 0x12c   :  { %v2401_v32 = vpop.eup %2400  ;;  %v312_v62 = vmul.f32 %v2399_v26, %v2655_v14  ;;  %v406_v53 = vadd.f32 %v342_v29, %v326_v20  ;;  %2416 = vlog2.f32 %v284_v18  ;;  %v366_v20 = vmul.f32 %v2660_v19, %v365_v21 }
 0x12d   :  { %v2403_v58 = vpop.eup %2402  ;;  %439 = vrot.lane.b32.xlu1 %v423_v27, %s2491_s2  ;;  %v319_v46 = vsel %vm303_vm2, %v2397_v17, %v311_v28  ;;  %v345_v12 = vmul.f32 0.6931472, %v2401_v32  ;;  %2418 = vrcp.f32 %v284_v18  ;;  %v391_v37 = vmul.f32 -0.5, %v2698_v9 }
 0x12e   :  { %v2405_v59 = vpop.eup %2404  ;;  %v424_v61 = vmul.f32 %v319_v46, %v2575_v36  ;;  %415 = vst.msk [vmem:[#allocation2] sm:$0xff] %vm414_vm1, %v406_v53  ;;  %v354_v14 = vmul.f32 0.6931472, %v2403_v58  ;;  %v320_v36 = vsel %vm304_vm4, %v2399_v26, %v312_v62  ;;  %2420 = vrcp.f32 %v2716_v33 }
 0x12f   :  { %v2407_v3 = vpop.eup %2406  ;;  %v313_v8 = vmul.f32 %v2405_v59, %v2660_v19  ;;  %v351_v13 = vsel %vm2687_vm5, %v348_v6, %v345_v12  ;;  %v383_v6 = vadd.f32 1.0, %v382_v50  ;;  %v473_v18 = vmul.f32 %v319_v46, %v2587_v42 }
 0x130   :  { %v2409_v17 = vpop.eup %2408  ;;  %441 = vrot.lane.b32.xlu0 %v424_v61, %s2491_s2  ;;  %v407_v16 = vadd.f32 %v351_v13, %v327_v23  ;;  %v360_v21 = vsel %vm2693_vm6, %v357_v15, %v354_v14  ;;  %v375_v23 = vmul.f32 %v2665_v22, %v374_v57  ;;  %v425_v26 = vmul.f32 %v320_v36, %v2579_v38 }
 0x131   :  { %v2411_v4 = vpop.eup %2410  ;;  %488 = vrot.lane.b32.xlu1 %v472_v5, %s2492_s20  ;;  %v408_v19 = vadd.f32 %v360_v21, %v328_v31  ;;  %v363_v63 = vmul.f32 0.6931472, %v2409_v17  ;;  %v321_v27 = vsel %vm305_vm7, %v2405_v59, %v313_v8  ;;  %v314_v11 = vmul.f32 %v2407_v3, %v2665_v22 }
 0x132   :  { %416 = vst.msk [vmem:[#allocation2 + $0x8] sm:$0xff] %vm414_vm1, %v407_v16  ;;  %v372_v10 = vmul.f32 0.6931472, %v2411_v4  ;;  %v2413_v15 = vpop.eup %2412  ;;  %v392_v38 = vadd.f32 1.0, %v391_v37  ;;  %v384_v62 = vmul.f32 %v2674_v34, %v383_v6  ;;  %v331_v53 = vmax.f32 %v2644_v55, 0.0  ;;  %v2822_v6 = vld [vmem:[%s3486_s3] sm:$0xff] }
 0x133   :  { %417 = vst.msk [vmem:[#allocation2 + $0x10] sm:$0xff] %vm414_vm1, %v408_v19  ;;  %v369_v42 = vsel %vm2710_vm8, %v366_v20, %v363_v63  ;;  %v2415_v31 = vpop.eup %2414  ;;  %v426_v24 = vmul.f32 %v321_v27, %v2581_v39  ;;  %v474_v57 = vmul.f32 %v320_v36, %v2591_v44  ;;  %v322_v58 = vsel %vm306_vm10, %v2407_v3, %v314_v11  ;;  %v2862_v11 = vld [vmem:[%s3486_s3 + $0x28] sm:$0xff] }
 0x134   :  { %490 = vrot.lane.b32.xlu0 %v473_v18, %s2492_s20  ;;  %v409_v28 = vadd.f32 %v369_v42, %v329_v35  ;;  %v378_v29 = vsel %vm2725_vm9, %v375_v23, %v372_v10  ;;  %v381_v32 = vmul.f32 0.6931472, %v2415_v31  ;;  %v393_v50 = vmul.f32 %v2698_v9, %v392_v38  ;;  %v2829_v10 = vld [vmem:[%s3486_s3 + $0x8] sm:$0xff]  ;;  %v2836_v23 = vld [vmem:[%s3486_s3 + $0x10] sm:$0xff]  ;;  %3506 = vst [vmem:[#allocation8_spill] sm:$0xff] %v2862_v11  ;;  %v2871_v31 = vld [vmem:[%s3486_s3 + $0x38] sm:$0xff] }
 0x135   :  { %443 = vrot.lane.b32.xlu1 %v425_v26, %s2491_s2  ;;  %v410_v22 = vadd.f32 %v378_v29, %v330_v52  ;;  %v315_v52 = vmul.f32 %v2413_v15, %v2674_v34  ;;  %2422 = vlog2.f32 %v2716_v33  ;;  %v332_v59 = vmax.f32 %v2650_v2, 0.0  ;;  %v2853_v26 = vld [vmem:[%s3486_s3 + $0x30] sm:$0xff]  ;;  %3507 = vst [vmem:[#allocation9_spill] sm:$0xff] %v2871_v31 }
 0x136   :  { %418 = vst.msk [vmem:[#allocation2 + $0x18] sm:$0xff] %vm414_vm1, %v409_v28  ;;  %v2417_v35 = vpop.eup %2416  ;;  %v387_v46 = vsel %vm386_vm11, %v384_v62, %v381_v32  ;;  %vm395_vm12 = vcmp.lt.f32.partialorder %v394_v30, 0.0004427343  ;;  %v475_v44 = vmul.f32 %v321_v27, %v2583_v40  ;;  %v427_v14 = vmul.f32 %v322_v58, %v2585_v41  ;;  %3505 = vst [vmem:[#allocation7_spill] sm:$0xff] %v2853_v26 }
 0x137   :  { %419 = vst.msk [vmem:[#allocation2 + $0x20] sm:$0xff] %vm414_vm1, %v410_v22  ;;  %v411_v12 = vadd.f32 %v387_v46, %v331_v53  ;;  %v390_v25 = vmul.f32 0.6931472, %v2417_v35  ;;  %v2419_v39 = vpop.eup %2418  ;;  %v323_v20 = vsel %vm307_vm13, %v2413_v15, %v315_v52  ;;  %v400_v33 = vmul.f32 -0.5, %v2678_v49  ;;  %v2848_v15 = vld [vmem:[%s3486_s3 + $0x18] sm:$0xff] }
 0x138   :  { %445 = vrot.lane.b32.xlu0 %v426_v24, %s2491_s2  ;;  %v2421_v61 = vpop.eup %2420  ;;  %v316_v3 = vmul.f32 %v2419_v39, %v2698_v9  ;;  %v428_v40 = vmul.f32 %v323_v20, %v2599_v48  ;;  %v476_v55 = vmul.f32 %v322_v58, %v2589_v43  ;;  %v403_v13 = vand.u32 2147483647, %v2678_v49 }
 0x139   :  { %492 = vrot.lane.b32.xlu1 %v474_v57, %s2492_s20  ;;  %420 = vst.msk [vmem:[#allocation2 + $0x28] sm:$0xff] %vm414_vm1, %v411_v12  ;;  %v396_v34 = vsel %vm395_vm12, %v393_v50, %v390_v25  ;;  %v317_v41 = vmul.f32 %v2421_v61, %v2678_v49  ;;  %v401_v5 = vadd.f32 1.0, %v400_v33  ;;  %v477_v17 = vmul.f32 %v323_v20, %v2593_v45  ;;  %v523_v33 = vld [vmem:[%s3487_s4 + $0x10] sm:$0xff] }
 0x13a   :  { %v412_v0 = vadd.f32 %v396_v34, %v332_v59  ;;  %v324_v8 = vsel %vm308_vm14, %v2419_v39, %v316_v3  ;;  %v333_v16 = vmax.f32 %v2646_v56, 0.0  ;;  %vm404_vm0 = vcmp.lt.f32.partialorder %v403_v13, 0.0004427343 }
 0x13b   :  { %v429_v48 = vmul.f32 %v324_v8, %v2597_v47  ;;  %v325_v2 = vsel %vm309_vm15, %v2421_v61, %v317_v41  ;;  %v402_v43 = vmul.f32 %v2678_v49, %v401_v5  ;;  %v478_v19 = vmul.f32 %v324_v8, %v2607_v51  ;;  %v521_v47 = vld [vmem:[%s3487_s4] sm:$0xff]  ;;  %v524_v41 = vld [vmem:[%s3487_s4 + $0x18] sm:$0xff] }
 0x13c   :  { %494 = vrot.lane.b32.xlu0 %v475_v44, %s2492_s20  ;;  %421 = vst.msk [vmem:[#allocation2 + $0x30] sm:$0xff] %vm414_vm1, %v412_v0  ;;  %v430_v37 = vmul.f32 %v325_v2, %v2611_v54  ;;  %v479_v45 = vmul.f32 %v325_v2, %v2617_v60  ;;  %vm537_vm2 = vcmask 523264   ;;  %v3489_v18 = vmov 7   ;;  %v522_v44 = vld [vmem:[%s3487_s4 + $0x8] sm:$0xff] }
 0x13d   :  { %447 = vrot.lane.b32.xlu1 %v427_v14, %s2491_s2  ;;  %v539_v54 = vsel %vm537_vm2, %v521_v47, 0  ;;  %2370 = vset.pattern.permute.xlu0 %v3489_v18  ;;  %v1408_v27 = vmul.f32 %v2822_v6, %v2536_v1  ;;  %v1410_v42 = vmul.f32 %v2836_v23, %v2536_v1  ;;  %v2494_v28 = vmov 6  }
 0x13e   :  { %v2812_v56 = vand.u32 4294901760, %v539_v54  ;;  %2369 = vset.pattern.permute.xlu1 %v3489_v18  ;;  %v1409_v29 = vmul.f32 %v2829_v10, %v2536_v1  ;;  %v1412_v38 = vmul.f32 %v2841_v7, %v2536_v1  ;;  %v1411_v22 = vmul.f32 %v2848_v15, %v2536_v1 }
 0x13f   :  { %v2423_v9 = vpop.eup %2422  ;;  %v1414_v32 = vmul.f32 %v2853_v26, %v2536_v1  ;;  %v1413_v62 = vmul.f32 %v2862_v11, %v2536_v1  ;;  %v1415_v30 = vmul.f32 %v2871_v31, %v2536_v1  ;;  %vm463_vm3 = vcmask 130112  }
 0x140   :  { %449 = vrot.lane.b32.xlu0 %v428_v40, %s2491_s2  ;;  %v399_v36 = vmul.f32 0.6931472, %v2423_v9  ;;  %v2815_v51 = vsub.f32 %v539_v54, %v2812_v56  ;;  %vm512_vm4 = vcmask 195712   ;;  %v542_v14 = vsel %vm537_vm2, %v522_v44, 0 }
 0x141   :  { %496 = vrot.lane.b32.xlu1 %v476_v55, %s2492_s20  ;;  %v2925_v3 = vand.u32 4294901760, %v542_v14  ;;  %v545_v9 = vsel %vm537_vm2, %v523_v33, 0  ;;  %v548_v2 = vsel %vm537_vm2, %v524_v41, 0 }
 0x142   :  { %v405_v21 = vsel %vm404_vm0, %v402_v43, %v399_v36  ;;  %v637_v49 = vand.u32 4294901760, %v2815_v51  ;;  %v2939_v43 = vand.u32 4294901760, %v545_v9  ;;  %v2957_v47 = vand.u32 4294901760, %v548_v2 }
 0x143   :  { %v413_v4 = vadd.f32 %v405_v21, %v333_v16  ;;  %v525_v16 = vld [vmem:[%s3487_s4 + $0x20] sm:$0xff] }
 0x144   :  { %498 = vrot.lane.b32.xlu0 %v477_v17, %s2492_s20  ;;  %v638_v63 = vsub.f32 %v2815_v51, %v637_v49  ;;  %2142 = vmatprep.mubr.f32.mxu0 %v637_v49  ;;  %v551_v49 = vsel %vm537_vm2, %v525_v16, 0 }
 0x145   :  { %451 = vrot.lane.b32.xlu1 %v429_v48, %s2491_s2  ;;  %422 = vst.msk [vmem:[#allocation2 + $0x38] sm:$0xff] %vm414_vm1, %v413_v4  ;;  %v2936_v48 = vsub.f32 %v542_v14, %v2925_v3  ;;  %v526_v4 = vld [vmem:[%s3487_s4 + $0x28] sm:$0xff] }
 0x146   :  { %v639_v60 = vand.u32 4294901760, %v638_v63 }
 0x147   :  { %v647_v54 = vand.u32 4294901760, %v2936_v48 }
 0x148   :  { %453 = vrot.lane.b32.xlu0 %v430_v37, %s2491_s2  ;;  %2058 = vmatprep.mubr.f32.mxu1 %v639_v60 }
 0x149   :  { %500 = vrot.lane.b32.xlu1 %v478_v19, %s2492_s20 }
 0x14c   :  { %502 = vrot.lane.b32.xlu0 %v479_v45, %s2492_s20 }
 0x14d   :  { %1742 = vperm.xlu1 %2369, %v2822_v6  }
 0x150   :  { %1746 = vperm.xlu0 %2370, %v2829_v10  }
 0x151   :  { %1750 = vperm.xlu1 %2369, %v2836_v23  }
 0x154   :  { %1758 = vperm.xlu0 %2370, %v2841_v7  }
 0x155   :  { %1754 = vperm.xlu1 %2369, %v2848_v15  }
 0x158   :  { %1766 = vperm.xlu0 %2370, %v2853_v26  }
 0x159   :  { %1762 = vperm.xlu1 %2369, %v2862_v11  }
 0x15c   :  { %1424 = vrot.lane.b32.xlu0 %v1408_v27, %s2489_s7  ;;  %v2962_v27 = vsub.f32 %v545_v9, %v2939_v43 }
 0x15d   :  { %2371 = vset.pattern.permute.xlu0 %v2494_v28  ;;  %1770 = vperm.xlu1 %2369, %v2871_v31  }
 0x160   :  { %1428 = vrot.lane.b32.xlu0 %v1410_v42, %s2489_s7  ;;  %v554_v42 = vsel %vm537_vm2, %v526_v4, 0 }
 0x161   :  { %1426 = vrot.lane.b32.xlu1 %v1409_v29, %s2489_s7 }
 0x162   :  { %2372 = vset.pattern.permute.xlu1 %v2494_v28 }
 0x164   :  { %1432 = vrot.lane.b32.xlu0 %v1412_v38, %s2489_s7 }
 0x165   :  { %1430 = vrot.lane.b32.xlu1 %v1411_v22, %s2489_s7 }
 0x168   :  { %1436 = vrot.lane.b32.xlu0 %v1414_v32, %s2489_s7  ;;  %v527_v32 = vld [vmem:[%s3487_s4 + $0x30] sm:$0xff] }
 0x169   :  { %1434 = vrot.lane.b32.xlu1 %v1413_v62, %s2489_s7 }
 0x16c   :  { %1674 = vperm.xlu0 %2371, %v2822_v6  }
 0x16d   :  { %1438 = vrot.lane.b32.xlu1 %v1415_v30, %s2489_s7 }
 0x170   :  { %1689 = vperm.xlu0 %2371, %v2848_v15  }
 0x171   :  { %1679 = vperm.xlu1 %2372, %v2829_v10  }
 0x174   :  { %1699 = vperm.xlu0 %2371, %v2862_v11  }
 0x175   :  { %1684 = vperm.xlu1 %2372, %v2836_v23  }
 0x179   :  { %1694 = vperm.xlu1 %2372, %v2841_v7  }
 0x17d   :  { %1704 = vperm.xlu1 %2372, %v2853_v26   ;;  %v3508_v26 = vand.u32 4294901760, %v2962_v27 }
 0x181   :  { %1709 = vperm.xlu1 %2372, %v2871_v31  }
 0x19f   :  { %v440_v53 = vpop.permute.xlu1 %439 }
 0x1a0   :  { %464 = vst.msk [vmem:[#allocation2] sm:$0xff] %vm463_vm3, %v440_v53  ;;  %v2976_v53 = vsub.f32 %v548_v2, %v2957_v47 }
 0x1a2   :  { %v442_v24 = vpop.permute.xlu0 %441  ;;  %v667_v14 = vand.u32 4294901760, %v2976_v53 }
 0x1a3   :  { %465 = vst.msk [vmem:[#allocation2 + $0x8] sm:$0xff] %vm463_vm3, %v442_v24  ;;  %v489_v35 = vpop.permute.xlu1 %488  ;;  %v2978_v24 = vand.u32 4294901760, %v551_v49 }
 0x1a4   :  { %513 = vst.msk [vmem:[#allocation2] sm:$0xff] %vm512_vm4, %v489_v35  ;;  %v528_v35 = vld [vmem:[%s3487_s4 + $0x38] sm:$0xff]  ;;  %s2496_s4 = smov 120  }
 0x1a6   :  { %v491_v1 = vpop.permute.xlu0 %490 }
 0x1a7   :  { %514 = vst.msk [vmem:[#allocation2 + $0x8] sm:$0xff] %vm512_vm4, %v491_v1  ;;  %v444_v57 = vpop.permute.xlu1 %443 }
 0x1a8   :  { %466 = vst.msk [vmem:[#allocation2 + $0x10] sm:$0xff] %vm463_vm3, %v444_v57  ;;  %v648_v57 = vsub.f32 %v2936_v48, %v647_v54 }
 0x1aa   :  { %v446_v58 = vpop.permute.xlu0 %445  ;;  %v649_v33 = vand.u32 4294901760, %v648_v57 }
 0x1ab   :  { %467 = vst.msk [vmem:[#allocation2 + $0x18] sm:$0xff] %vm463_vm3, %v446_v58  ;;  %v493_v52 = vpop.permute.xlu1 %492  ;;  %v529_v46 = vld [vmem:[#allocation2] sm:$0xff]  ;;  %v3490_v58 = vand.u32 4294901760, %v2962_v27 }
 0x1ac   :  { %515 = vst.msk [vmem:[#allocation2 + $0x10] sm:$0xff] %vm512_vm4, %v493_v52  ;;  %v563_v39 = vand.u32 4294901760, %v529_v46  ;;  %v2989_v52 = vand.u32 4294901760, %v554_v42 }
 0x1ad   :  { %v658_v41 = vsub.f32 %v2962_v27, %v3490_v58 }
 0x1ae   :  { %v495_v12 = vpop.permute.xlu0 %494  ;;  %v530_v25 = vld [vmem:[#allocation2 + $0x8] sm:$0xff]  ;;  %v2955_v45 = vsub.f32 %v529_v46, %v563_v39  ;;  %v557_v46 = vsel %vm537_vm2, %v527_v32, 0 }
 0x1af   :  { %516 = vst.msk [vmem:[#allocation2 + $0x18] sm:$0xff] %vm512_vm4, %v495_v12  ;;  %v448_v50 = vpop.permute.xlu1 %447  ;;  %v566_v59 = vand.u32 4294901760, %v530_v25 }
 0x1b0   :  { %468 = vst.msk [vmem:[#allocation2 + $0x20] sm:$0xff] %vm463_vm3, %v448_v50  ;;  %v718_v62 = vand.u32 4294901760, %v2955_v45 }
 0x1b1   :  { %v2912_v34 = vpack.c.bf16 %v566_v59, %v563_v39  ;;  %v2947_v37 = vsub.f32 %v530_v25, %v566_v59  ;;  %v560_v59 = vsel %vm537_vm2, %v528_v35, 0 }
 0x1b2   :  { %v450_v61 = vpop.permute.xlu0 %449  ;;  %v719_v44 = vsub.f32 %v2955_v45, %v718_v62 }
 0x1b3   :  { %469 = vst.msk [vmem:[#allocation2 + $0x28] sm:$0xff] %vm463_vm3, %v450_v61  ;;  %v497_v20 = vpop.permute.xlu1 %496  ;;  %2211 = vmatprep.subr.bf16.mxu1 %v2912_v34  ;;  %2259 = vmatprep.subr.bf16.mxu0 %v2912_v34  ;;  %v531_v0 = vld [vmem:[#allocation2 + $0x10] sm:$0xff]  ;;  %v725_v38 = vand.u32 4294901760, %v2947_v37 }
 0x1b4   :  { %517 = vst.msk [vmem:[#allocation2 + $0x20] sm:$0xff] %vm512_vm4, %v497_v20  ;;  %2213 = vmatpush3.bf16.msra.mxu1 %v2912_v34  ;;  %2261 = vmatpush3.bf16.msra.mxu0 %v2912_v34  ;;  %v569_v8 = vand.u32 4294901760, %v531_v0  ;;  %v3005_v20 = vsub.f32 %v551_v49, %v2978_v24 }
 0x1b5   :  { %v726_v25 = vsub.f32 %v2947_v37, %v725_v38 }
 0x1b6   :  { %v499_v40 = vpop.permute.xlu0 %498  ;;  %v532_v55 = vld [vmem:[#allocation2 + $0x18] sm:$0xff]  ;;  %v2973_v30 = vsub.f32 %v531_v0, %v569_v8  ;;  %v677_v49 = vand.u32 4294901760, %v3005_v20 }
 0x1b7   :  { %518 = vst.msk [vmem:[#allocation2 + $0x28] sm:$0xff] %vm512_vm4, %v499_v40  ;;  %v452_v5 = vpop.permute.xlu1 %451  ;;  %v572_v13 = vand.u32 4294901760, %v532_v55  ;;  %v727_v2 = vand.u32 4294901760, %v726_v25 }
 0x1b8   :  { %470 = vst.msk [vmem:[#allocation2 + $0x30] sm:$0xff] %vm463_vm3, %v452_v5  ;;  %v732_v61 = vand.u32 4294901760, %v2973_v30  ;;  %v3013_v5 = vsub.f32 %v554_v42, %v2989_v52 }
 0x1b9   :  { %v2933_v17 = vpack.c.bf16 %v572_v13, %v569_v8  ;;  %v2967_v22 = vsub.f32 %v532_v55, %v572_v13  ;;  %v3015_v8 = vand.u32 4294901760, %v557_v46  ;;  %v3017_v13 = vand.u32 4294901760, %v560_v59 }
 0x1ba   :  { %v454_v36 = vpop.permute.xlu0 %453  ;;  %v733_v4 = vsub.f32 %v2973_v30, %v732_v61  ;;  %v687_v32 = vand.u32 4294901760, %v3013_v5 }
 0x1bb   :  { %471 = vst.msk [vmem:[#allocation2 + $0x38] sm:$0xff] %vm463_vm3, %v454_v36  ;;  %v501_v21 = vpop.permute.xlu1 %500  ;;  %2215 = vmatprep.subr.bf16.mxu1 %v2933_v17  ;;  %2263 = vmatprep.subr.bf16.mxu0 %v2933_v17  ;;  %v533_v19 = vld [vmem:[#allocation2 + $0x20] sm:$0xff]  ;;  %v739_v50 = vand.u32 4294901760, %v2967_v22  ;;  %v3033_v35 = vsub.f32 %v557_v46, %v3015_v8  ;;  %v3036_v57 = vsub.f32 %v560_v59, %v3017_v13 }
 0x1bc   :  { %519 = vst.msk [vmem:[#allocation2 + $0x30] sm:$0xff] %vm512_vm4, %v501_v21  ;;  %2217 = vmatpush3.bf16.msra.mxu1 %v2933_v17  ;;  %2265 = vmatpush3.bf16.msra.mxu0 %v2933_v17  ;;  %v575_v28 = vand.u32 4294901760, %v533_v19  ;;  %v720_v21 = vand.u32 4294901760, %v719_v44 }
 0x1bd   :  { %v740_v36 = vsub.f32 %v2967_v22, %v739_v50  ;;  %v2278_v18 = vpack.c.bf16 %v739_v50, %v732_v61 }
 0x1be   :  { %v503_v63 = vpop.permute.xlu0 %502  ;;  %v534_v60 = vld [vmem:[#allocation2 + $0x28] sm:$0xff]  ;;  %v3007_v40 = vsub.f32 %v533_v19, %v575_v28  ;;  %v668_v19 = vsub.f32 %v2976_v53, %v667_v14  ;;  %v2226_v25 = vpack.c.bf16 %v727_v2, %v720_v21  ;;  %v688_v2 = vsub.f32 %v3013_v5, %v687_v32 }
 0x1bf   :  { %520 = vst.msk [vmem:[#allocation2 + $0x38] sm:$0xff] %vm512_vm4, %v503_v63  ;;  %v578_v29 = vand.u32 4294901760, %v534_v60  ;;  %v741_v44 = vand.u32 4294901760, %v740_v36  ;;  %v697_v36 = vand.u32 4294901760, %v3033_v35  ;;  %v707_v21 = vand.u32 4294901760, %v3036_v57 }
 0x1c0   :  { %v669_v46 = vand.u32 4294901760, %v668_v19  ;;  %v689_v11 = vand.u32 4294901760, %v688_v2 }
 0x1c1   :  { %v2983_v1 = vpack.c.bf16 %v578_v29, %v575_v28  ;;  %v2996_v39 = vsub.f32 %v534_v60, %v578_v29  ;;  %v746_v60 = vand.u32 4294901760, %v3007_v40  ;;  %v2274_v29 = vpack.c.bf16 %v725_v38, %v718_v62 }
 0x1c2   :  { %v659_v38 = vand.u32 4294901760, %v658_v41  ;;  %v734_v62 = vand.u32 4294901760, %v733_v4 }
 0x1c3   :  { %2219 = vmatprep.subr.bf16.mxu1 %v2983_v1  ;;  %2267 = vmatprep.subr.bf16.mxu0 %v2983_v1  ;;  %v535_v12 = vld [vmem:[#allocation2 + $0x30] sm:$0xff]  ;;  %v753_v16 = vand.u32 4294901760, %v2996_v39  ;;  %v747_v59 = vsub.f32 %v3007_v40, %v746_v60 }
 0x1c4   :  { %2221 = vmatpush3.bf16.msra.mxu1 %v2983_v1  ;;  %2269 = vmatpush3.bf16.msra.mxu0 %v2983_v1  ;;  %v581_v0 = vand.u32 4294901760, %v535_v12  ;;  %v2230_v41 = vpack.c.bf16 %v741_v44, %v734_v62 }
 0x1c5   :  { %v748_v58 = vand.u32 4294901760, %v747_v59  ;;  %v2282_v61 = vpack.c.bf16 %v753_v16, %v746_v60 }
 0x1c6   :  { %v536_v55 = vld [vmem:[#allocation2 + $0x38] sm:$0xff]  ;;  %v3027_v42 = vsub.f32 %v535_v12, %v581_v0  ;;  %v754_v12 = vsub.f32 %v2996_v39, %v753_v16 }
 0x1c7   :  { %v584_v9 = vand.u32 4294901760, %v536_v55 }
 0x1c8   :  { %v755_v4 = vand.u32 4294901760, %v754_v12 }
 0x1c9   :  { %v3024_v63 = vpack.c.bf16 %v584_v9, %v581_v0  ;;  %v3029_v28 = vsub.f32 %v536_v55, %v584_v9  ;;  %v760_v55 = vand.u32 4294901760, %v3027_v42  ;;  %v678_v9 = vsub.f32 %v3005_v20, %v677_v49 }
 0x1ca   :  { %v2234_v50 = vpack.c.bf16 %v755_v4, %v748_v58 }
 0x1cb   :  { %2223 = vmatprep.subr.bf16.mxu1 %v3024_v63  ;;  %2271 = vmatprep.subr.bf16.mxu0 %v3024_v63  ;;  %v767_v0 = vand.u32 4294901760, %v3029_v28  ;;  %v761_v31 = vsub.f32 %v3027_v42, %v760_v55 }
 0x1cc   :  { %2225 = vmatpush3.bf16.msra.mxu1 %v3024_v63  ;;  %2273 = vmatpush3.bf16.msra.mxu0 %v3024_v63 }
 0x1cd   :  { %2227 = vmatprep.subr.bf16.mxu1 %v2226_v25  ;;  %2275 = vmatprep.subr.bf16.mxu0 %v2274_v29  ;;  %v768_v19 = vsub.f32 %v3029_v28, %v767_v0 }
 0x1cf   :  { %2059 = vmatmul.mubr.f32.vlgmr.msra.gmra.mrb[0].mxu1 %v649_v33  ;;  %2143 = vmatmul.mubr.f32.vlgmr.msra.gmra.mrb[0].mxu0 %v647_v54  ;;  %v679_v33 = vand.u32 4294901760, %v678_v9  ;;  %v698_v54 = vsub.f32 %v3033_v35, %v697_v36  ;;  %v769_v44 = vand.u32 4294901760, %v768_v19 }
 0x1d0   :  { %2229 = vmatpush3.bf16.msra.mxu1 %v2226_v25  ;;  %2277 = vmatpush3.bf16.msra.mxu0 %v2274_v29  ;;  %v708_v29 = vsub.f32 %v3036_v57, %v707_v21  ;;  %v762_v25 = vand.u32 4294901760, %v761_v31  ;;  %v2250_v31 = vpack.c.bf16 %v2996_v39, %v3007_v40 }
 0x1d1   :  { %2231 = vmatprep.subr.bf16.mxu1 %v2230_v41  ;;  %2279 = vmatprep.subr.bf16.mxu0 %v2278_v18  ;;  %v699_v12 = vand.u32 4294901760, %v698_v54 }
 0x1d2   :  { %2061 = vmatprep.mubr.f32.mxu1 %v659_v38  ;;  %2145 = vmatprep.mubr.f32.mxu0 %v3508_v26  ;;  %v2238_v26 = vpack.c.bf16 %v769_v44, %v762_v25  ;;  %v2286_v38 = vpack.c.bf16 %v767_v0, %v760_v55  ;;  %v709_v62 = vand.u32 4294901760, %v708_v29 }
 0x1d3   :  { %2062 = vmatmul.mubr.f32.gmra.mrb[2].mxu1 %v669_v46  ;;  %2146 = vmatmul.mubr.f32.gmra.mrb[2].mxu0 %v667_v14 }
 0x1d4   :  { %2233 = vmatpush3.bf16.msra.mxu1 %v2230_v41  ;;  %2281 = vmatpush3.bf16.msra.mxu0 %v2278_v18  ;;  %v2242_v18 = vpack.c.bf16 %v2947_v37, %v2955_v45 }
 0x1d5   :  { %2235 = vmatprep.subr.bf16.mxu1 %v2234_v50  ;;  %2283 = vmatprep.subr.bf16.mxu0 %v2282_v61 }
 0x1d6   :  { %2064 = vmatprep.mubr.f32.mxu1 %v679_v33  ;;  %2148 = vmatprep.mubr.f32.mxu0 %v677_v49 }
 0x1d7   :  { %2065 = vmatmul.mubr.f32.gmra.mrb[4].mxu1 %v689_v11  ;;  %2149 = vmatmul.mubr.f32.gmra.mrb[4].mxu0 %v687_v32  ;;  %v2246_v11 = vpack.c.bf16 %v2967_v22, %v2973_v30 }
 0x1d8   :  { %2237 = vmatpush3.bf16.msra.mxu1 %v2234_v50  ;;  %2285 = vmatpush3.bf16.msra.mxu0 %v2282_v61 }
 0x1d9   :  { %2239 = vmatprep.subr.bf16.mxu1 %v2238_v26  ;;  %2287 = vmatprep.subr.bf16.mxu0 %v2286_v38 }
 0x1da   :  { %2067 = vmatprep.mubr.f32.mxu1 %v699_v12  ;;  %2151 = vmatprep.mubr.f32.mxu0 %v697_v36 }
 0x1db   :  { %2068 = vmatmul.mubr.f32.gmra.mrb[6].mxu1 %v709_v62  ;;  %2152 = vmatmul.mubr.f32.gmra.mrb[6].mxu0 %v707_v21  ;;  %v3510_v62 = vld [vmem:[#allocation7_spill] sm:$0xff] }
 0x1dc   :  { %2241 = vmatpush3.bf16.msra.mxu1 %v2238_v26  ;;  %2289 = vmatpush3.bf16.msra.mxu0 %v2286_v38  ;;  %v3509_v26 = vld [vmem:[#allocation8_spill] sm:$0xff] }
 0x1dd   :  { %2243 = vmatprep.subr.bf16.mxu1 %v2242_v18  ;;  %2291 = vmatprep.subr.bf16.mxu0 %v2912_v34 }
 0x1de   :  { %2086 = vmatprep.mubr.f32.mxu1 %v2812_v56  ;;  %2170 = vmatprep.mubr.f32.mxu0 %v2812_v56 }
 0x1df   :  { %2087 = vmatmul.mubr.f32.vlgmr.msra.gmra.mrb[0].mxu1 %v2925_v3  ;;  %2171 = vmatmul.mubr.f32.vlgmr.msra.gmra.mrb[0].mxu0 %v2925_v3 }
 0x1e0   :  { %2245 = vmatpush3.bf16.msra.mxu1 %v2242_v18  ;;  %2293 = vmatpush3.bf16.msra.mxu0 %v2912_v34  ;;  %v2254_v34 = vpack.c.bf16 %v3029_v28, %v3027_v42 }
 0x1e1   :  { %2247 = vmatprep.subr.bf16.mxu1 %v2246_v11  ;;  %2295 = vmatprep.subr.bf16.mxu0 %v2933_v17 }
 0x1e2   :  { %2089 = vmatprep.mubr.f32.mxu1 %v2939_v43  ;;  %2173 = vmatprep.mubr.f32.mxu0 %v2939_v43 }
 0x1e3   :  { %2090 = vmatmul.mubr.f32.gmra.mrb[2].mxu1 %v2957_v47  ;;  %2174 = vmatmul.mubr.f32.gmra.mrb[2].mxu0 %v2957_v47 }
 0x1e4   :  { %2249 = vmatpush3.bf16.msra.mxu1 %v2246_v11  ;;  %2297 = vmatpush3.bf16.msra.mxu0 %v2933_v17  ;;  %v3110_v17 = vpop.permute.xlu0 %1746 }
 0x1e5   :  { %2251 = vmatprep.subr.bf16.mxu1 %v2250_v31  ;;  %2299 = vmatprep.subr.bf16.mxu0 %v2983_v1 }
 0x1e6   :  { %2092 = vmatprep.mubr.f32.mxu1 %v2978_v24  ;;  %2176 = vmatprep.mubr.f32.mxu0 %v2978_v24 }
 0x1e7   :  { %2093 = vmatmul.mubr.f32.gmra.mrb[4].mxu1 %v2989_v52  ;;  %2177 = vmatmul.mubr.f32.gmra.mrb[4].mxu0 %v2989_v52 }
 0x1e8   :  { %2253 = vmatpush3.bf16.msra.mxu1 %v2250_v31  ;;  %2301 = vmatpush3.bf16.msra.mxu0 %v2983_v1  ;;  %v3512_v31 = vmov 7  }
 0x1e9   :  { %2255 = vmatprep.subr.bf16.mxu1 %v2254_v34  ;;  %2303 = vmatprep.subr.bf16.mxu0 %v3024_v63 }
 0x1ea   :  { %2095 = vmatprep.mubr.f32.mxu1 %v3015_v8  ;;  %2179 = vmatprep.mubr.f32.mxu0 %v3015_v8 }
 0x1eb   :  { %2096 = vmatmul.mubr.f32.gmra.mrb[6].mxu1 %v3017_v13  ;;  %2180 = vmatmul.mubr.f32.gmra.mrb[6].mxu0 %v3017_v13 }
 0x1ec   :  { %2257 = vmatpush3.bf16.msra.mxu1 %v2254_v34  ;;  %2305 = vmatpush3.bf16.msra.mxu0 %v3024_v63 }
 0x1ed   :  { %2114 = vmatprep.mubr.f32.mxu1 %v2815_v51  ;;  %2198 = vmatprep.mubr.f32.mxu0 %v2812_v56  ;;  %v2495_v56 = vmov 4   ;;  %v3106_v51 = vpop.permute.xlu1 %1742 }
 0x1ee   :  { %2373 = vset.pattern.permute.xlu1 %v2495_v56  ;;  %2374 = vset.pattern.permute.xlu0 %v2495_v56 }
 0x1ef   :  { %2115 = vmatmul.mubr.f32.vlgmr.msra.gmra.mrb[0].mxu1 %v2936_v48  ;;  %2199 = vmatmul.mubr.f32.vlgmr.msra.gmra.mrb[0].mxu0 %v2925_v3 }
 0x1f0   :  { %2117 = vmatprep.mubr.f32.mxu1 %v2962_v27  ;;  %2201 = vmatprep.mubr.f32.mxu0 %v2939_v43  ;;  %v3114_v43 = vpop.permute.xlu0 %1758 }
 0x1f1   :  { %v3108_v3 = vpop.permute.xlu1 %1750 }
 0x1f3   :  { %2118 = vmatmul.mubr.f32.gmra.mrb[2].mxu1 %v2976_v53  ;;  %2202 = vmatmul.mubr.f32.gmra.mrb[2].mxu0 %v2957_v47 }
 0x1f4   :  { %2120 = vmatprep.mubr.f32.mxu1 %v3005_v20  ;;  %2204 = vmatprep.mubr.f32.mxu0 %v2978_v24  ;;  %v3122_v24 = vpop.permute.xlu0 %1766 }
 0x1f5   :  { %v3112_v48 = vpop.permute.xlu1 %1754 }
 0x1f7   :  { %2121 = vmatmul.mubr.f32.gmra.mrb[4].mxu1 %v3013_v5  ;;  %2205 = vmatmul.mubr.f32.gmra.mrb[4].mxu0 %v2989_v52 }
 0x1f8   :  { %2123 = vmatprep.mubr.f32.mxu1 %v3033_v35  ;;  %2207 = vmatprep.mubr.f32.mxu0 %v3015_v8  ;;  %v1425_v32 = vpop.permute.xlu0 %1424 }
 0x1f9   :  { %v3116_v37 = vpop.permute.xlu1 %1762  ;;  %v1448_v19 = vadd.f32 %v1425_v32, %v2822_v6 }
 0x1fb   :  { %2124 = vmatmul.mubr.f32.gmra.mrb[6].mxu1 %v3036_v57  ;;  %2208 = vmatmul.mubr.f32.gmra.mrb[6].mxu0 %v3017_v13 }
 0x1fc   :  { %v1429_v4 = vpop.permute.xlu0 %1428 }
 0x1fd   :  { %v3134_v8 = vpop.permute.xlu1 %1770  ;;  %v1450_v61 = vadd.f32 %v1429_v4, %v2836_v23  ;;  %v3511_v23 = vld [vmem:[#allocation9_spill] sm:$0xff] }
 0x200   :  { %v1433_v44 = vpop.permute.xlu0 %1432 }
 0x201   :  { %v1427_v36 = vpop.permute.xlu1 %1426  ;;  %v1452_v6 = vadd.f32 %v1433_v44, %v2841_v7 }
 0x202   :  { %v1449_v50 = vadd.f32 %v1427_v36, %v2829_v10 }
 0x204   :  { %v1437_v12 = vpop.permute.xlu0 %1436 }
 0x205   :  { %v1431_v54 = vpop.permute.xlu1 %1430  ;;  %v1454_v18 = vadd.f32 %v1437_v12, %v3510_v62 }
 0x206   :  { %v1451_v29 = vadd.f32 %v1431_v54, %v2848_v15 }
 0x208   :  { %v3175_v34 = vpop.permute.xlu0 %1674 }
 0x209   :  { %v1435_v25 = vpop.permute.xlu1 %1434 }
 0x20a   :  { %v1453_v38 = vadd.f32 %v1435_v25, %v3509_v26 }
 0x20d   :  { %v1439_v10 = vpop.permute.xlu1 %1438 }
 0x20e   :  { %v1455_v11 = vadd.f32 %v1439_v10, %v3511_v23 }
 0x211   :  { %v3171_v15 = vpop.permute.xlu1 %1679 }
 0x215   :  { %v3173_v7 = vpop.permute.xlu1 %1684 }
 0x219   :  { %v3177_v56 = vpop.permute.xlu1 %1694 }
 0x2c2   :  { %v2116_v45 = vpop.f32.mrb[0].mxu1  ;;  %v2200_v47 = vpop.f32.mrb[0].mxu0 }
 0x2c3   :  { %v3118_v27 = vadd.f32 %v2200_v47, %v2116_v45  ;;  %v952_v22 = vpop.f32.mrb[1].mxu1  ;;  %v1354_v30 = vpop.f32.mrb[1].mxu0 }
 0x2c4   :  { %v3120_v53 = vadd.f32 %v1354_v30, %v952_v22  ;;  %v3179_v45 = vpop.permute.xlu0 %1689  ;;  %v3181_v47 = vpop.permute.xlu1 %1704 }
 0x2c5   :  { %v1811_v1 = vmul.f32 %v3118_v27, %v3110_v17 }
 0x2c6   :  { %v2119_v58 = vpop.f32.mrb[2].mxu1  ;;  %v2203_v52 = vpop.f32.mrb[2].mxu0  ;;  %v1810_v39 = vmul.f32 %v3120_v53, %v3106_v51 }
 0x2c7   :  { %v3128_v14 = vadd.f32 %v2203_v52, %v2119_v58  ;;  %v1366_v20 = vpop.f32.mrb[3].mxu0  ;;  %1828 = vrot.lane.b32.xlu0 %v1811_v1, %s2496_s4  ;;  %v966_v40 = vpop.f32.mrb[3].mxu1  ;;  %v1803_v1 = vmul.f32 %v3118_v27, %v3171_v15  ;;  %v1802_v58 = vmul.f32 %v3120_v53, %v3175_v34 }
 0x2c8   :  { %v3131_v5 = vadd.f32 %v1366_v20, %v966_v40  ;;  %1826 = vrot.lane.b32.xlu1 %v1810_v39, %s2496_s4  ;;  %v3183_v22 = vpop.permute.xlu0 %1699  ;;  %v3185_v30 = vpop.permute.xlu1 %1709 }
 0x2c9   :  { %v1813_v46 = vmul.f32 %v3128_v14, %v3112_v48 }
 0x2ca   :  { %v2122_v13 = vpop.f32.mrb[4].mxu1  ;;  %v2206_v16 = vpop.f32.mrb[4].mxu0  ;;  %v1812_v49 = vmul.f32 %v3131_v5, %v3108_v3 }
 0x2cb   :  { %v3138_v63 = vadd.f32 %v2206_v16, %v2122_v13  ;;  %v980_v60 = vpop.f32.mrb[5].mxu1  ;;  %v1378_v42 = vpop.f32.mrb[5].mxu0  ;;  %v1804_v13 = vmul.f32 %v3131_v5, %v3173_v7 }
 0x2cc   :  { %v3140_v28 = vadd.f32 %v1378_v42, %v980_v60  ;;  %1830 = vrot.lane.b32.xlu0 %v1812_v49, %s2496_s4  ;;  %v1805_v60 = vmul.f32 %v3128_v14, %v3179_v45 }
 0x2cd   :  { %v1815_v41 = vmul.f32 %v3138_v63, %v3116_v37 }
 0x2ce   :  { %v2125_v35 = vpop.f32.mrb[6].mxu1  ;;  %v2209_v57 = vpop.f32.mrb[6].mxu0  ;;  %v1814_v0 = vmul.f32 %v3140_v28, %v3114_v43  ;;  %v1806_v42 = vmul.f32 %v3140_v28, %v3177_v56 }
 0x2cf   :  { %v3147_v59 = vadd.f32 %v2209_v57, %v2125_v35  ;;  %v994_v55 = vpop.f32.mrb[7].mxu1  ;;  %v1390_v9 = vpop.f32.mrb[7].mxu0 }
 0x2d0   :  { %v3149_v2 = vadd.f32 %v1390_v9, %v994_v55  ;;  %1834 = vrot.lane.b32.xlu1 %v1814_v0, %s2496_s4  ;;  %1832 = vrot.lane.b32.xlu0 %v1813_v46, %s2496_s4  ;;  %v1807_v46 = vmul.f32 %v3138_v63, %v3183_v22 }
 0x2d1   :  { %v1817_v33 = vmul.f32 %v3147_v59, %v3134_v8  ;;  %v1809_v4 = vmul.f32 %v3147_v59, %v3185_v30 }
 0x2d2   :  { %v1816_v21 = vmul.f32 %v3149_v2, %v3122_v24  ;;  %v1808_v55 = vmul.f32 %v3149_v2, %v3181_v47 }
 0x2d4   :  { %1838 = vrot.lane.b32.xlu1 %v1816_v21, %s2496_s4  ;;  %1836 = vrot.lane.b32.xlu0 %v1815_v41, %s2496_s4 }
 0x2d8   :  { %1458 = vperm.xlu1 %2373, %v1448_v19   ;;  %1840 = vrot.lane.b32.xlu0 %v1817_v33, %s2496_s4 }
 0x2dc   :  { %1468 = vperm.xlu1 %2373, %v1450_v61   ;;  %1463 = vperm.xlu0 %2374, %v1449_v50  }
 0x2e0   :  { %1478 = vperm.xlu0 %2374, %v1452_v6   ;;  %1473 = vperm.xlu1 %2373, %v1451_v29  }
 0x2e4   :  { %1488 = vperm.xlu0 %2374, %v1454_v18   ;;  %1483 = vperm.xlu1 %2373, %v1453_v38  }
 0x2e8   :  { %1493 = vperm.xlu1 %2373, %v1455_v11   ;;  %2375 = vset.pattern.permute.xlu0 %v3512_v31 }
 0x339   :  { %v1829_v52 = vpop.permute.xlu0 %1828 }
 0x33a   :  { %v1851_v39 = vadd.f32 %v1829_v52, %v1803_v1  ;;  %v1827_v20 = vpop.permute.xlu1 %1826 }
 0x33b   :  { %v1850_v40 = vadd.f32 %v1827_v20, %v1802_v58 }
 0x33c   :  { %1868 = vrot.lane.b32.xlu1 %v1851_v39, %s2496_s4 }
 0x33d   :  { %1866 = vrot.lane.b32.xlu0 %v1850_v40, %s2496_s4 }
 0x33e   :  { %v1831_v16 = vpop.permute.xlu0 %1830 }
 0x33f   :  { %v1852_v49 = vadd.f32 %v1831_v16, %v1804_v13 }
 0x341   :  { %1870 = vrot.lane.b32.xlu0 %v1852_v49, %s2496_s4 }
 0x342   :  { %v1833_v32 = vpop.permute.xlu0 %1832  ;;  %v1835_v35 = vpop.permute.xlu1 %1834 }
 0x343   :  { %v1853_v57 = vadd.f32 %v1833_v32, %v1805_v60  ;;  %v1854_v0 = vadd.f32 %v1835_v35, %v1806_v42 }
 0x345   :  { %1872 = vrot.lane.b32.xlu1 %v1853_v57, %s2496_s4  ;;  %1874 = vrot.lane.b32.xlu0 %v1854_v0, %s2496_s4 }
 0x346   :  { %v1837_v9 = vpop.permute.xlu0 %1836  ;;  %v1839_v36 = vpop.permute.xlu1 %1838 }
 0x347   :  { %v1855_v21 = vadd.f32 %v1837_v9, %v1807_v46  ;;  %v1856_v41 = vadd.f32 %v1839_v36, %v1808_v55 }
 0x349   :  { %1876 = vrot.lane.b32.xlu1 %v1855_v21, %s2496_s4  ;;  %1878 = vrot.lane.b32.xlu0 %v1856_v41, %s2496_s4 }
 0x34a   :  { %v1841_v19 = vpop.permute.xlu0 %1840 }
 0x34b   :  { %v1857_v33 = vadd.f32 %v1841_v19, %v1809_v4 }
 0x34d   :  { %1880 = vrot.lane.b32.xlu1 %v1857_v33, %s2496_s4 }
 0x357   :  { %v1459_v54 = vpop.permute.xlu1 %1458 }
 0x358   :  { %v3212_v50 = vadd.f32 %v3120_v53, %v1459_v54 }
 0x35a   :  { %v1504_v61 = vand.u32 2147483647, %v3212_v50  ;;  %vm1560_vm14 = vcmp.ge.f32.partialorder %v3212_v50, 0.0 }
 0x35b   :  { %v1464_v44 = vpop.permute.xlu0 %1463  ;;  %v1469_v29 = vpop.permute.xlu1 %1468 }
 0x35c   :  { %v1512_v6 = vsub.f32 0.0, %v1504_v61  ;;  %v3216_v25 = vadd.f32 %v3118_v27, %v1464_v44  ;;  %v3219_v12 = vadd.f32 %v3131_v5, %v1469_v29 }
 0x35e   :  { %v1520_v26 = vmul.f32 1.442695, %v1512_v6  ;;  %v1505_v38 = vand.u32 2147483647, %v3216_v25  ;;  %v1506_v62 = vand.u32 2147483647, %v3219_v12 }
 0x35f   :  { %v1479_v18 = vpop.permute.xlu0 %1478  ;;  %v1474_v10 = vpop.permute.xlu1 %1473  ;;  %vm1561_vm12 = vcmp.ge.f32.partialorder %v3216_v25, 0.0  ;;  %vm1562_vm15 = vcmp.ge.f32.partialorder %v3219_v12, 0.0 }
 0x360   :  { %2424 = vpow2.f32 %v1520_v26  ;;  %v1513_v53 = vsub.f32 0.0, %v1505_v38  ;;  %v3224_v23 = vadd.f32 %v3140_v28, %v1479_v18  ;;  %v3227_v11 = vadd.f32 %v3128_v14, %v1474_v10 }
 0x361   :  { %v1514_v27 = vsub.f32 0.0, %v1506_v62 }
 0x362   :  { %v1522_v31 = vmul.f32 1.442695, %v1513_v53  ;;  %v1508_v5 = vand.u32 2147483647, %v3224_v23  ;;  %v1507_v58 = vand.u32 2147483647, %v3227_v11 }
 0x363   :  { %v1524_v1 = vmul.f32 1.442695, %v1514_v27  ;;  %v1489_v52 = vpop.permute.xlu0 %1488  ;;  %v1484_v39 = vpop.permute.xlu1 %1483  ;;  %vm1564_vm0 = vcmp.ge.f32.partialorder %v3224_v23, 0.0  ;;  %vm1563_vm2 = vcmp.ge.f32.partialorder %v3227_v11, 0.0 }
 0x364   :  { %2426 = vpow2.f32 %v1522_v31  ;;  %v1516_v20 = vsub.f32 0.0, %v1508_v5  ;;  %v3232_v40 = vadd.f32 %v3149_v2, %v1489_v52  ;;  %v3235_v28 = vadd.f32 %v3138_v63, %v1484_v39 }
 0x365   :  { %2428 = vpow2.f32 %v1524_v1  ;;  %v1515_v14 = vsub.f32 0.0, %v1507_v58 }
 0x366   :  { %v1528_v13 = vmul.f32 1.442695, %v1516_v20  ;;  %v1510_v16 = vand.u32 2147483647, %v3232_v40  ;;  %v1509_v60 = vand.u32 2147483647, %v3235_v28 }
 0x367   :  { %v1526_v49 = vmul.f32 1.442695, %v1515_v14  ;;  %v1494_v42 = vpop.permute.xlu1 %1493  ;;  %vm1566_vm3 = vcmp.ge.f32.partialorder %v3232_v40, 0.0  ;;  %vm1565_vm4 = vcmp.ge.f32.partialorder %v3235_v28, 0.0 }
 0x368   :  { %2430 = vpow2.f32 %v1528_v13  ;;  %v1518_v32 = vsub.f32 0.0, %v1510_v16  ;;  %v3240_v35 = vadd.f32 %v3147_v59, %v1494_v42  ;;  %v1517_v2 = vsub.f32 0.0, %v1509_v60 }
 0x369   :  { %2432 = vpow2.f32 %v1526_v49  ;;  %v1584_v59 = vmax.f32 %v3212_v50, 0.0 }
 0x36a   :  { %v3242_v57 = vpop.eup %2424  ;;  %v1532_v63 = vmul.f32 1.442695, %v1518_v32  ;;  %v1511_v0 = vand.u32 2147483647, %v3240_v35  ;;  %v1530_v55 = vmul.f32 1.442695, %v1517_v2 }
 0x36b   :  { %v3246_v46 = vadd.f32 1.0, %v3242_v57  ;;  %v1595_v21 = vmul.f32 -0.5, %v3242_v57  ;;  %v1598_v26 = vand.u32 2147483647, %v3242_v57 }
 0x36c   :  { %2434 = vpow2.f32 %v1532_v63  ;;  %v1519_v9 = vsub.f32 0.0, %v1511_v0 }
 0x36d   :  { %2436 = vlog2.f32 %v3246_v46  ;;  %v1596_v10 = vadd.f32 1.0, %v1595_v21  ;;  %vm3284_vm5 = vcmp.lt.f32.partialorder %v1598_v26, 0.0004427343 }
 0x36e   :  { %v3249_v36 = vpop.eup %2426  ;;  %2438 = vpow2.f32 %v1530_v55  ;;  %v1534_v41 = vmul.f32 1.442695, %v1519_v9 }
 0x36f   :  { %v3253_v4 = vpop.eup %2428  ;;  %v1537_v19 = vadd.f32 1.0, %v3249_v36  ;;  %v1604_v44 = vmul.f32 -0.5, %v3249_v36  ;;  %v1607_v5 = vand.u32 2147483647, %v3249_v36  ;;  %v1597_v32 = vmul.f32 %v3242_v57, %v1596_v10 }
 0x370   :  { %v3261_v29 = vadd.f32 1.0, %v3253_v4  ;;  %v1613_v6 = vmul.f32 -0.5, %v3253_v4  ;;  %2440 = vpow2.f32 %v1534_v41  ;;  %v1616_v1 = vand.u32 2147483647, %v3253_v4 }
 0x371   :  { %2442 = vlog2.f32 %v1537_v19  ;;  %v1605_v39 = vadd.f32 1.0, %v1604_v44  ;;  %vm3295_vm6 = vcmp.lt.f32.partialorder %v1607_v5, 0.0004427343 }
 0x372   :  { %v3267_v18 = vpop.eup %2430  ;;  %2444 = vlog2.f32 %v3261_v29  ;;  %v1614_v20 = vadd.f32 1.0, %v1613_v6  ;;  %vm3299_vm7 = vcmp.lt.f32.partialorder %v1616_v1, 0.0004427343 }
 0x373   :  { %v3272_v31 = vpop.eup %2432  ;;  %v3277_v58 = vadd.f32 1.0, %v3267_v18  ;;  %v1631_v52 = vmul.f32 -0.5, %v3267_v18  ;;  %v1634_v60 = vand.u32 2147483647, %v3267_v18  ;;  %v1606_v26 = vmul.f32 %v3249_v36, %v1605_v39 }
 0x374   :  { %3513 = vst [vmem:[#allocation8_spill] sm:$0xff] %v3272_v31  ;;  %v3281_v14 = vadd.f32 1.0, %v3272_v31  ;;  %v1622_v13 = vmul.f32 -0.5, %v3272_v31  ;;  %v1625_v63 = vand.u32 2147483647, %v3272_v31  ;;  %v1615_v10 = vmul.f32 %v3253_v4, %v1614_v20 }
 0x375   :  { %2446 = vlog2.f32 %v3277_v58  ;;  %v1632_v49 = vadd.f32 1.0, %v1631_v52  ;;  %vm3312_vm8 = vcmp.lt.f32.partialorder %v1634_v60, 0.0004427343 }
 0x376   :  { %v3290_v42 = vpop.eup %2434  ;;  %2448 = vlog2.f32 %v3281_v14  ;;  %v1623_v2 = vadd.f32 1.0, %v1622_v13  ;;  %vm3326_vm9 = vcmp.lt.f32.partialorder %v1625_v63, 0.0004427343 }
 0x377   :  { %v2437_v0 = vpop.eup %2436  ;;  %v3304_v21 = vadd.f32 1.0, %v3290_v42  ;;  %v1649_v41 = vmul.f32 -0.5, %v3290_v42  ;;  %2450 = vrcp.f32 %v1537_v19  ;;  %v1633_v5 = vmul.f32 %v3267_v18, %v1632_v49 }
 0x378   :  { %v3307_v44 = vpop.eup %2438  ;;  %v1594_v6 = vmul.f32 0.6931472, %v2437_v0  ;;  %v1652_v52 = vand.u32 2147483647, %v3290_v42  ;;  %v1624_v19 = vmul.f32 %v3272_v31, %v1623_v2 }
 0x379   :  { %2452 = vlog2.f32 %v3304_v21  ;;  %v3319_v13 = vadd.f32 1.0, %v3307_v44  ;;  %v1650_v49 = vadd.f32 1.0, %v1649_v41  ;;  %v1640_v60 = vmul.f32 -0.5, %v3307_v44 }
 0x37a   :  { %v3321_v27 = vpop.eup %2440  ;;  %v1600_v39 = vsel %vm3284_vm5, %v1597_v32, %v1594_v6  ;;  %v1643_v62 = vand.u32 2147483647, %v3307_v44  ;;  %vm3350_vm10 = vcmp.lt.f32.partialorder %v1652_v52, 0.0004427343  ;;  %vm1567_vm5 = vcmp.ge.f32.partialorder %v3240_v35, 0.0 }
 0x37b   :  { %v2443_v0 = vpop.eup %2442  ;;  %v1664_v53 = vadd.f32 %v1600_v39, %v1584_v59  ;;  %2454 = vlog2.f32 %v3319_v13  ;;  %v3334_v38 = vadd.f32 1.0, %v3321_v27  ;;  %v1641_v6 = vadd.f32 1.0, %v1640_v60 }
 0x37c   :  { %v2445_v16 = vpop.eup %2444  ;;  %v1603_v32 = vmul.f32 0.6931472, %v2443_v0  ;;  %v1658_v2 = vmul.f32 -0.5, %v3321_v27  ;;  %2456 = vrcp.f32 %v3246_v46  ;;  %v1651_v39 = vmul.f32 %v3290_v42, %v1650_v49 }
 0x37d   :  { %v1712_v63 = vmul.f32 %v3175_v34, %v1664_v53  ;;  %v1773_v41 = vmul.f32 %v3106_v51, %v1664_v53  ;;  %v1612_v61 = vmul.f32 0.6931472, %v2445_v16  ;;  %2458 = vlog2.f32 %v3334_v38 }
 0x37e   :  { %v1609_v59 = vsel %vm3295_vm6, %v1606_v26, %v1603_v32  ;;  %v1659_v54 = vadd.f32 1.0, %v1658_v2  ;;  %v1661_v0 = vand.u32 2147483647, %v3321_v27  ;;  %v3524_v46 = vmax.f32 %v3216_v25, 0.0 }
 0x37f   :  { %v2447_v60 = vpop.eup %2446  ;;  %v1720_v33 = vsel %vm414_vm1, %v1712_v63, 0.0  ;;  %v1618_v51 = vsel %vm3299_vm7, %v1615_v10, %v1612_v61  ;;  %v1642_v53 = vmul.f32 %v3307_v44, %v1641_v6  ;;  %vm3355_vm11 = vcmp.lt.f32.partialorder %v1643_v62, 0.0004427343 }
 0x380   :  { %v1665_v31 = vadd.f32 %v1609_v59, %v3524_v46  ;;  %v2449_v26 = vpop.eup %2448  ;;  %v1781_v49 = vsel %vm414_vm1, %v1773_v41, 0.0  ;;  %v3529_v16 = vmax.f32 %v3219_v12, 0.0  ;;  %v1630_v9 = vmul.f32 0.6931472, %v2447_v60 }
 0x381   :  { %v1660_v61 = vmul.f32 %v3321_v27, %v1659_v54  ;;  %v1621_v6 = vmul.f32 0.6931472, %v2449_v26  ;;  %vm3366_vm13 = vcmp.lt.f32.partialorder %v1661_v0, 0.0004427343  ;;  %2460 = vrcp.f32 %v3261_v29  ;;  %v2451_v2 = vpop.eup %2450 }
 0x382   :  { %v1666_v32 = vadd.f32 %v1618_v51, %v3529_v16  ;;  %v1713_v10 = vmul.f32 %v3171_v15, %v1665_v31  ;;  %v1774_v52 = vmul.f32 %v3110_v17, %v1665_v31  ;;  %v1636_v59 = vsel %vm3312_vm8, %v1633_v5, %v1630_v9 }
 0x383   :  { %2462 = vrcp.f32 %v3277_v58  ;;  %v2453_v15 = vpop.eup %2452  ;;  %v3532_v31 = vmax.f32 %v3224_v23, 0.0  ;;  %v1627_v29 = vsel %vm3326_vm9, %v1624_v19, %v1621_v6  ;;  %v3533_v51 = vmax.f32 %v3227_v11, 0.0 }
 0x384   :  { %v1714_v63 = vmul.f32 %v3173_v7, %v1666_v32  ;;  %v1775_v41 = vmul.f32 %v3108_v3, %v1666_v32  ;;  %v1721_v17 = vsel %vm414_vm1, %v1713_v10, 0.0  ;;  %v1782_v54 = vsel %vm414_vm1, %v1774_v52, 0.0 }
 0x385   :  { %v1668_v0 = vadd.f32 %v1636_v59, %v3532_v31  ;;  %v1722_v7 = vadd.f32 %v1721_v17, %v1720_v33  ;;  %v1783_v3 = vadd.f32 %v1782_v54, %v1781_v49  ;;  %v2455_v58 = vpop.eup %2454  ;;  %v1667_v26 = vadd.f32 %v1627_v29, %v3533_v51 }
 0x386   :  { %v1723_v1 = vsel %vm414_vm1, %v1714_v63, 0.0  ;;  %v1784_v5 = vsel %vm414_vm1, %v1775_v41, 0.0  ;;  %v1648_v16 = vmul.f32 0.6931472, %v2453_v15  ;;  %v2457_v32 = vpop.eup %2456  ;;  %v1639_v9 = vmul.f32 0.6931472, %v2455_v58 }
 0x387   :  { %v1716_v60 = vmul.f32 %v3177_v56, %v1668_v0  ;;  %v1777_v46 = vmul.f32 %v3114_v43, %v1668_v0  ;;  %v1724_v20 = vadd.f32 %v1723_v1, %v1722_v7  ;;  %v1785_v19 = vadd.f32 %v1784_v5, %v1783_v3  ;;  %v2459_v49 = vpop.eup %2458 }
 0x388   :  { %v1569_v33 = vmul.f32 %v2451_v2, %v3249_v36  ;;  %v1715_v6 = vmul.f32 %v3179_v45, %v1667_v26  ;;  %v1776_v56 = vmul.f32 %v3112_v48, %v1667_v26  ;;  %v1654_v43 = vsel %vm3350_vm10, %v1651_v39, %v1648_v16 }
 0x389   :  { %v1727_v10 = vsel %vm414_vm1, %v1716_v60, 0.0  ;;  %v1788_v52 = vsel %vm414_vm1, %v1777_v46, 0.0  ;;  %v1645_v63 = vsel %vm3355_vm11, %v1642_v53, %v1639_v9  ;;  %v1657_v41 = vmul.f32 0.6931472, %v2459_v49 }
 0x38a   :  { %v3400_v59 = vsel %vm1561_vm12, %v2451_v2, %v1569_v33  ;;  %v1725_v36 = vsel %vm414_vm1, %v1715_v6, 0.0  ;;  %v1786_v15 = vsel %vm414_vm1, %v1776_v56, 0.0  ;;  %v3534_v45 = vmax.f32 %v3232_v40, 0.0 }
 0x38b   :  { %v3535_v34 = vmax.f32 %v3235_v28, 0.0  ;;  %v1726_v17 = vadd.f32 %v1725_v36, %v1724_v20  ;;  %v1787_v55 = vadd.f32 %v1786_v15, %v1785_v19  ;;  %v1663_v53 = vsel %vm3366_vm13, %v1660_v61, %v1657_v41  ;;  %v2461_v2 = vpop.eup %2460 }
 0x38c   :  { %v1670_v48 = vadd.f32 %v1654_v43, %v3534_v45  ;;  %v1568_v25 = vmul.f32 %v2457_v32, %v3242_v57  ;;  %v3536_v5 = vmax.f32 %v3240_v35, 0.0  ;;  %v1570_v46 = vmul.f32 %v2461_v2, %v3253_v4 }
 0x38d   :  { %v1669_v39 = vadd.f32 %v1645_v63, %v3535_v34  ;;  %v2463_v7 = vpop.eup %2462  ;;  %v1728_v3 = vadd.f32 %v1727_v10, %v1726_v17  ;;  %v1789_v1 = vadd.f32 %v1788_v52, %v1787_v55  ;;  %2464 = vrcp.f32 %v3281_v14 }
 0x38e   :  { %v1718_v54 = vmul.f32 %v3181_v47, %v1670_v48  ;;  %v1779_v31 = vmul.f32 %v3122_v24, %v1670_v48  ;;  %v1671_v62 = vadd.f32 %v1663_v53, %v3536_v5  ;;  %v3422_v57 = vsel %vm1560_vm14, %v2457_v32, %v1568_v25 }
 0x38f   :  { %v1717_v0 = vmul.f32 %v3183_v22, %v1669_v39  ;;  %v1778_v29 = vmul.f32 %v3116_v37, %v1669_v39  ;;  %v1572_v51 = vmul.f32 %v2463_v7, %v3267_v18  ;;  %2466 = vrcp.f32 %v3304_v21 }
 0x390   :  { %v1731_v47 = vsel %vm414_vm1, %v1718_v54, 0.0  ;;  %v1719_v58 = vmul.f32 %v3185_v30, %v1671_v62  ;;  %v1780_v60 = vmul.f32 %v3134_v8, %v1671_v62  ;;  %v1792_v50 = vsel %vm414_vm1, %v1779_v31, 0.0 }
 0x391   :  { %v1729_v24 = vsel %vm414_vm1, %v1717_v0, 0.0  ;;  %v1790_v22 = vsel %vm414_vm1, %v1778_v29, 0.0  ;;  %v1578_v8 = vsel %vm1562_vm15, %v2461_v2, %v1570_v46  ;;  %v1580_v30 = vsel %vm1564_vm0, %v2463_v7, %v1572_v51 }
 0x392   :  { %v1730_v37 = vadd.f32 %v1729_v24, %v1728_v3  ;;  %v1791_v61 = vadd.f32 %v1790_v22, %v1789_v1  ;;  %v1733_v32 = vsel %vm414_vm1, %v1719_v58, 0.0  ;;  %v1794_v20 = vsel %vm414_vm1, %v1780_v60, 0.0 }
 0x393   :  { %2468 = vrcp.f32 %v3319_v13  ;;  %v1923_v6 = vstv %s1922_s10  ;;  %v1931_v48 = vstv %s1930_s11  ;;  %vm1925_vm6 = vcmask 57344  }
 0x394   :  { %v1732_v26 = vadd.f32 %v1731_v47, %v1730_v37  ;;  %v1793_v16 = vadd.f32 %v1792_v50, %v1791_v61  ;;  %2470 = vrcp.f32 %v3334_v38  ;;  %v3537_v38 = vld [vmem:[#allocation8_spill] sm:$0xff] }
 0x396   :  { %v1734_v4 = vadd.f32 %v1733_v32, %v1732_v26  ;;  %v1795_v18 = vadd.f32 %v1794_v20, %v1793_v16 }
 0x397   :  { %v2465_v33 = vpop.eup %2464 }
 0x398   :  { %v1735_v14 = vrot.slane %v1734_v4, 4  ;;  %v1796_v19 = vrot.slane %v1795_v18, 4  ;;  %v1571_v10 = vmul.f32 %v2465_v33, %v3537_v38 }
 0x399   :  { %v2467_v52 = vpop.eup %2466 }
 0x39a   :  { %v1736_v12 = vadd.f32 %v1735_v14, %v1734_v4  ;;  %v1797_v23 = vadd.f32 %v1796_v19, %v1795_v18  ;;  %v1579_v41 = vsel %vm1563_vm2, %v2465_v33, %v1571_v10  ;;  %v1574_v36 = vmul.f32 %v2467_v52, %v3290_v42 }
 0x39c   :  { %v1737_v21 = vrot.slane %v1736_v12, 2  ;;  %v1798_v9 = vrot.slane %v1797_v23, 2  ;;  %v1582_v17 = vsel %vm1566_vm3, %v2467_v52, %v1574_v36 }
 0x39d   :  { %v2469_v56 = vpop.eup %2468 }
 0x39e   :  { %v1738_v13 = vadd.f32 %v1737_v21, %v1736_v12  ;;  %v1799_v49 = vadd.f32 %v1798_v9, %v1797_v23  ;;  %v2471_v15 = vpop.eup %2470  ;;  %v1573_v45 = vmul.f32 %v2469_v56, %v3307_v44 }
 0x39f   :  { %v1575_v11 = vmul.f32 %v2471_v15, %v3321_v27 }
 0x3a0   :  { %v1739_v43 = vrot.slane %v1738_v13, 1  ;;  %v1800_v63 = vrot.slane %v1799_v49, 1  ;;  %v1581_v55 = vsel %vm1565_vm4, %v2469_v56, %v1573_v45 }
 0x3a1   :  { %v1583_v53 = vsel %vm1567_vm5, %v2471_v15, %v1575_v11 }
 0x3a2   :  { %v1740_v34 = vadd.f32 %v1739_v43, %v1738_v13  ;;  %v1801_v39 = vadd.f32 %v1800_v63, %v1799_v49 }
 0x3a4   :  { %v1924_v25 = vadd.f32 %v1923_v6, %v1740_v34  ;;  %v1932_v42 = vadd.f32 %v1931_v48, %v1801_v39 }
 0x3a6   :  { %1926 = vst.msk [vmem:[%s3488_s5] sm:$0x1] %vm1925_vm6, %v1924_v25  ;;  %1933 = vst.msk [vmem:[%s3488_s5 + $0x1] sm:$0x1] %vm1925_vm6, %v1932_v42 }
 0x3ae   :  { %v1869_v40 = vpop.permute.xlu1 %1868 }
 0x3af   :  { %v1891_v28 = vmul.f32 %v1869_v40, %v3400_v59  ;;  %v1867_v27 = vpop.permute.xlu0 %1866 }
 0x3b0   :  { %v1890_v35 = vmul.f32 %v1867_v27, %v3422_v57 }
 0x3b1   :  { %v1899_v44 = vsel %vm414_vm1, %v1891_v28, 0.0 }
 0x3b2   :  { %v1898_v2 = vsel %vm414_vm1, %v1890_v35, 0.0 }
 0x3b3   :  { %v1900_v54 = vadd.f32 %v1899_v44, %v1898_v2  ;;  %v1871_v31 = vpop.permute.xlu0 %1870 }
 0x3b4   :  { %v1892_v0 = vmul.f32 %v1871_v31, %v1578_v8 }
 0x3b6   :  { %v1901_v29 = vsel %vm414_vm1, %v1892_v0, 0.0 }
 0x3b7   :  { %v1902_v7 = vadd.f32 %v1901_v29, %v1900_v54  ;;  %v1875_v3 = vpop.permute.xlu0 %1874  ;;  %v1873_v1 = vpop.permute.xlu1 %1872 }
 0x3b8   :  { %v1894_v5 = vmul.f32 %v1875_v3, %v1580_v30  ;;  %v1893_v62 = vmul.f32 %v1873_v1, %v1579_v41 }
 0x3ba   :  { %v1903_v47 = vsel %vm414_vm1, %v1893_v62, 0.0  ;;  %v1905_v57 = vsel %vm414_vm1, %v1894_v5, 0.0 }
 0x3bb   :  { %v1904_v59 = vadd.f32 %v1903_v47, %v1902_v7  ;;  %v1879_v24 = vpop.permute.xlu0 %1878  ;;  %v1877_v22 = vpop.permute.xlu1 %1876 }
 0x3bc   :  { %v1896_v37 = vmul.f32 %v1879_v24, %v1582_v17  ;;  %v1895_v61 = vmul.f32 %v1877_v22, %v1581_v55 }
 0x3bd   :  { %v1906_v58 = vadd.f32 %v1905_v57, %v1904_v59 }
 0x3be   :  { %v1907_v60 = vsel %vm414_vm1, %v1895_v61, 0.0  ;;  %v1909_v51 = vsel %vm414_vm1, %v1896_v37, 0.0 }
 0x3bf   :  { %v1908_v50 = vadd.f32 %v1907_v60, %v1906_v58  ;;  %v1881_v46 = vpop.permute.xlu1 %1880 }
 0x3c0   :  { %v1897_v26 = vmul.f32 %v1881_v46, %v1583_v53 }
 0x3c1   :  { %v1910_v16 = vadd.f32 %v1909_v51, %v1908_v50 }
 0x3c2   :  { %v1911_v32 = vsel %vm414_vm1, %v1897_v26, 0.0 }
 0x3c3   :  { %v1912_v20 = vadd.f32 %v1911_v32, %v1910_v16 }
 0x3c5   :  { %v1913_v8 = vrot.slane %v1912_v20, 4 }
 0x3c7   :  { %v1914_v30 = vadd.f32 %v1913_v8, %v1912_v20 }
 0x3c9   :  { %v1915_v4 = vrot.slane %v1914_v30, 2 }
 0x3cb   :  { %v1916_v18 = vadd.f32 %v1915_v4, %v1914_v30 }
 0x3cd   :  { %v1917_v14 = vrot.slane %v1916_v18, 1 }
 0x3cf   :  { %v1918_v19 = vadd.f32 %v1917_v14, %v1916_v18 }
 0x3d1   :  { %v1934_v12 = vsub.f32 0.0, %v1918_v19 }
 0x3d3   :  { %1935 = vst.msk [vmem:[%s3488_s5 + $0x2] sm:$0x1] %vm1925_vm6, %v1934_v12 }
 0x3d4   :  { %1940 = vsyncpa [#allocation5], 1 }

</bundles_post_ra>
